<compile_context>
chip_gen: v7x
topology: tpu7x:2x2x1
jax: 0.10.0
libtpu: 0.0.40
codegen_flags: <defaults>
</compile_context>

<pallas_src>
import functools

import jax
import jax.numpy as jnp
from jax.experimental import pallas as pl
from jax.experimental.pallas import tpu as pltpu

F32 = jnp.float32
BF16 = jnp.bfloat16
NEG_INF = -1e9


def _tpu_generation_config():
    """Generation-aware scoped-VMEM cap and matmul tile targets."""
    vmem = None
    try:
        info = pltpu.get_tpu_info()
        vmem = getattr(info, "vmem_capacity_bytes", None)
    except Exception:
        vmem = None
    if vmem is not None and vmem >= 100 * 1024 * 1024:
        # v5e / v6e: 128 MiB VMEM per TensorCore.
        return {"vmem_limit": 100 * 1024 * 1024, "tm": 1024, "tn": 1024, "tk": 512}
    # v7x (64 MiB per TC, 2 TCs) or unknown: keep tiles small & cap conservative.
    return {"vmem_limit": 48 * 1024 * 1024, "tm": 512, "tn": 512, "tk": 512}


_CFG = _tpu_generation_config()
VMEM_LIMIT = _CFG["vmem_limit"]
TM, TN, TK = _CFG["tm"], _CFG["tn"], _CFG["tk"]


def _fit(dim, target, align):
    """Largest tile <= target that divides `dim` and is a multiple of `align`.

    Falls back to the full dim (always a legal Pallas block). At the small demo
    shapes every tile collapses to the full dim.
    """
    if dim <= target:
        return dim
    t = (target // align) * align
    while t >= align:
        if dim % t == 0:
            return t
        t -= align
    return dim


# ----------------------------- Pallas kernels -------------------------------


def _dense_kernel(x_ref, w_ref, b_ref, o_ref, acc_ref, *, act):
    @pl.when(pl.program_id(2) == 0)
    def _init():
        acc_ref[...] = jnp.zeros_like(acc_ref)

    acc_ref[...] += jnp.dot(x_ref[...], w_ref[...],
                            preferred_element_type=jnp.float32)

    @pl.when(pl.program_id(2) == pl.num_programs(2) - 1)
    def _finalize():
        y = acc_ref[...] + b_ref[...]
        if act == "gelu":
            # TODO(synk): HF BERT uses exact (erf) GELU; tanh approximation here
            # (kept in f32 -- matters on v5e which has no bf16 VPU/EUP).
            y = 0.5 * y * (1.0 + jnp.tanh(0.7978845608028654 *
                                          (y + 0.044715 * y * y * y)))
        o_ref[...] = y.astype(o_ref.dtype)


def dense(x, w_bf16, b, act=None, *, out_dtype=BF16, tm=TM, tn=TN, tk=TK):
    """y = act(x @ w + b). x/w bf16 MXU feeds, f32 accumulator, out_dtype store."""
    M, K = x.shape
    N = w_bf16.shape[1]
    tm = _fit(M, tm, 8)
    tn = _fit(N, tn, 128)
    tk = _fit(K, tk, 128)
    return pl.pallas_call(
        functools.partial(_dense_kernel, act=act),
        out_shape=jax.ShapeDtypeStruct((M, N), out_dtype),
        grid=(M // tm, N // tn, K // tk),
        in_specs=[
            pl.BlockSpec((tm, tk), lambda i, j, k: (i, k)),
            pl.BlockSpec((tk, tn), lambda i, j, k: (k, j)),
            pl.BlockSpec((1, tn), lambda i, j, k: (0, j)),
        ],
        out_specs=pl.BlockSpec((tm, tn), lambda i, j, k: (i, j)),
        scratch_shapes=[pltpu.VMEM((tm, tn), jnp.float32)],
        compiler_params=pltpu.CompilerParams(
            dimension_semantics=("parallel", "parallel", "arbitrary"),
            vmem_limit_bytes=VMEM_LIMIT),
    )(x, w_bf16, b.reshape(1, N))


def _dense_res_ln_kernel(x_ref, w_ref, b_ref, r_ref, g_ref, bb_ref, o_ref,
                         acc_ref, *, eps):
    k = pl.program_id(1)

    @pl.when(k == 0)
    def _init():
        acc_ref[...] = jnp.zeros_like(acc_ref)

    acc_ref[...] += jnp.dot(x_ref[...], w_ref[...],
                            preferred_element_type=jnp.float32)

    @pl.when(k == pl.num_programs(1) - 1)
    def _finalize():
        # Fused bias + residual + LayerNorm, all in f32.
        y = acc_ref[...] + b_ref[...] + r_ref[...].astype(jnp.float32)
        mu = jnp.mean(y, axis=-1, keepdims=True)
        var = jnp.mean((y - mu) ** 2, axis=-1, keepdims=True)
        out = ((y - mu) * jax.lax.rsqrt(var + eps)) * g_ref[...] + bb_ref[...]
        o_ref[...] = out.astype(o_ref.dtype)


def dense_residual_layernorm(x, w_bf16, b, residual, gamma, beta,
                             *, eps=1e-12, tm=TM, tk=TK):
    """y = LayerNorm(x @ w + b + residual). Keeps tn = full hidden per tile."""
    M, K = x.shape
    N = w_bf16.shape[1]
    tm = _fit(M, tm, 8)
    tk = _fit(K, tk, 128)
    return pl.pallas_call(
        functools.partial(_dense_res_ln_kernel, eps=eps),
        out_shape=jax.ShapeDtypeStruct((M, N), BF16),
        grid=(M // tm, K // tk),
        in_specs=[
            pl.BlockSpec((tm, tk), lambda i, k: (i, k)),
            pl.BlockSpec((tk, N), lambda i, k: (k, 0)),
            pl.BlockSpec((1, N), lambda i, k: (0, 0)),
            pl.BlockSpec((tm, N), lambda i, k: (i, 0)),
            pl.BlockSpec((1, N), lambda i, k: (0, 0)),
            pl.BlockSpec((1, N), lambda i, k: (0, 0)),
        ],
        out_specs=pl.BlockSpec((tm, N), lambda i, k: (i, 0)),
        scratch_shapes=[pltpu.VMEM((tm, N), jnp.float32)],
        compiler_params=pltpu.CompilerParams(
            dimension_semantics=("parallel", "arbitrary"),
            vmem_limit_bytes=VMEM_LIMIT),
    )(x, w_bf16, b.reshape(1, N), residual, gamma.reshape(1, N),
      beta.reshape(1, N))


def _qkv_dense_kernel(x_ref, w_ref, b_ref, o_ref, acc_ref, *, hidden):
    @pl.when(pl.program_id(1) == 0)
    def _init():
        acc_ref[...] = jnp.zeros_like(acc_ref)

    # Single (tm, 3H) matmul: x tile is read once for Q, K and V.
    acc_ref[...] += jnp.dot(x_ref[...], w_ref[...],
                            preferred_element_type=jnp.float32)

    @pl.when(pl.program_id(1) == pl.num_programs(1) - 1)
    def _finalize():
        y = acc_ref[...] + b_ref[...]
        o_ref[0] = y[:, 0:hidden].astype(o_ref.dtype)
        o_ref[1] = y[:, hidden:2 * hidden].astype(o_ref.dtype)
        o_ref[2] = y[:, 2 * hidden:3 * hidden].astype(o_ref.dtype)


def qkv_dense(x, w_stacked_bf16, b_stacked, *, hidden, tm=TM, tk=TK):
    """Fused Q/K/V projection: x (M,K) @ w (K,3H) -> slab (3, M, H) bf16."""
    M, K = x.shape
    tm = _fit(M, tm, 8)
    tk = _fit(K, tk, 128)
    return pl.pallas_call(
        functools.partial(_qkv_dense_kernel, hidden=hidden),
        out_shape=jax.ShapeDtypeStruct((3, M, hidden), BF16),
        grid=(M // tm, K // tk),
        in_specs=[
            pl.BlockSpec((tm, tk), lambda i, k: (i, k)),
            pl.BlockSpec((tk, 3 * hidden), lambda i, k: (k, 0)),
            pl.BlockSpec((1, 3 * hidden), lambda i, k: (0, 0)),
        ],
        out_specs=pl.BlockSpec((3, tm, hidden), lambda i, k: (0, i, 0)),
        scratch_shapes=[pltpu.VMEM((tm, 3 * hidden), jnp.float32)],
        compiler_params=pltpu.CompilerParams(
            dimension_semantics=("parallel", "arbitrary"),
            vmem_limit_bytes=VMEM_LIMIT),
    )(x, w_stacked_bf16, b_stacked)


def _flash_attention_kernel(q_ref, k_ref, v_ref, bias_ref, o_ref,
                            m_sc, l_sc, acc_sc, *, num_heads, head_dim):
    ki = pl.program_id(2)

    @pl.when(ki == 0)
    def _init():
        m_sc[...] = jnp.full_like(m_sc, -1e30)
        l_sc[...] = jnp.zeros_like(l_sc)
        acc_sc[...] = jnp.zeros_like(acc_sc)

    bias = bias_ref[0]                      # (1, tk) additive mask bias, f32

    dn_qkt = (((1,), (1,)), ((), ()))       # q @ k^T -> (tq, tk)

    # Static unroll over heads. Per-head slices are loaded directly from the
    # Refs (cheap strided vlds) -- no full-width hoisted values to spill.
    # Softmax scale is pre-folded into the Q projection weights.
    for h in range(num_heads):
        lo, hi = h * head_dim, (h + 1) * head_dim
        q_h = q_ref[0, :, lo:hi]            # (tq, Dh) bf16
        k_h = k_ref[0, :, lo:hi]            # (tk, Dh) bf16
        s = jax.lax.dot_general(q_h, k_h, dn_qkt,
                                preferred_element_type=jnp.float32)
        s = s + bias
        m_prev = m_sc[:, h:h + 1]
        l_prev = l_sc[:, h:h + 1]
        m_new = jnp.maximum(m_prev, jnp.max(s, axis=-1, keepdims=True))
        alpha = jnp.exp(m_prev - m_new)
        p = jnp.exp(s - m_new)
        l_sc[:, h:h + 1] = alpha * l_prev + jnp.sum(p, axis=-1, keepdims=True)
        acc_sc[:, lo:hi] = alpha * acc_sc[:, lo:hi] + jnp.dot(
            p.astype(BF16), v_ref[0, :, lo:hi],
            preferred_element_type=jnp.float32)
        m_sc[:, h:h + 1] = m_new

    @pl.when(ki == pl.num_programs(2) - 1)
    def _finalize():
        inv = pl.reciprocal(l_sc[...], approx=True)     # (tq, num_heads)
        for h in range(num_heads):
            lo, hi = h * head_dim, (h + 1) * head_dim
            acc_sc[:, lo:hi] = acc_sc[:, lo:hi] * inv[:, h:h + 1]
        # Single lane-dense output store of the full (tq, hidden) row block.
        o_ref[...] = acc_sc[...].astype(o_ref.dtype)


def flash_attention(qkv, mask_bias, *, batch, seq, num_heads, tq=128, tk=256):
    """qkv: (3, B*S, hidden) slab from the fused projection -> (B*S, hidden)."""
    _, M, hidden = qkv.shape
    head_dim = hidden // num_heads
    tq = _fit(seq, tq, 8)
    tk = _fit(seq, tk, 128)
    nq = seq // tq
    nk = seq // tk
    kernel = functools.partial(_flash_attention_kernel,
                               num_heads=num_heads, head_dim=head_dim)
    return pl.pallas_call(
        kernel,
        out_shape=jax.ShapeDtypeStruct((M, hidden), BF16),
        grid=(batch, nq, nk),
        in_specs=[
            pl.BlockSpec((1, tq, hidden), lambda b, qi, ki: (0, b * nq + qi, 0)),
            pl.BlockSpec((1, tk, hidden), lambda b, qi, ki: (1, b * nk + ki, 0)),
            pl.BlockSpec((1, tk, hidden), lambda b, qi, ki: (2, b * nk + ki, 0)),
            pl.BlockSpec((1, 1, tk), lambda b, qi, ki: (b, 0, ki)),
        ],
        out_specs=pl.BlockSpec((tq, hidden), lambda b, qi, ki: (b * nq + qi, 0)),
        scratch_shapes=[
            pltpu.VMEM((tq, num_heads), jnp.float32),   # packed running max
            pltpu.VMEM((tq, num_heads), jnp.float32),   # packed running sum
            pltpu.VMEM((tq, hidden), jnp.float32),      # lane-dense accumulator
        ],
        compiler_params=pltpu.CompilerParams(
            dimension_semantics=("parallel", "parallel", "arbitrary"),
            vmem_limit_bytes=VMEM_LIMIT),
    )(qkv, qkv, qkv, mask_bias)


def _layernorm_kernel(x_ref, g_ref, b_ref, o_ref, *, eps):
    x = x_ref[...].astype(jnp.float32)
    mu = jnp.mean(x, axis=-1, keepdims=True)
    var = jnp.mean((x - mu) ** 2, axis=-1, keepdims=True)
    out = ((x - mu) * jax.lax.rsqrt(var + eps)) * g_ref[...] + b_ref[...]
    o_ref[...] = out.astype(o_ref.dtype)


def layernorm(x, gamma, beta, *, eps=1e-12, tm=1024):
    M, H = x.shape
    tm = _fit(M, tm, 8)
    return pl.pallas_call(
        functools.partial(_layernorm_kernel, eps=eps),
        out_shape=jax.ShapeDtypeStruct((M, H), BF16),
        grid=(M // tm,),
        in_specs=[
            pl.BlockSpec((tm, H), lambda i: (i, 0)),
            pl.BlockSpec((1, H), lambda i: (0, 0)),
            pl.BlockSpec((1, H), lambda i: (0, 0)),
        ],
        out_specs=pl.BlockSpec((tm, H), lambda i: (i, 0)),
        compiler_params=pltpu.CompilerParams(
            dimension_semantics=("parallel",),
            vmem_limit_bytes=VMEM_LIMIT),
    )(x, gamma.reshape(1, H), beta.reshape(1, H))


def _ce_loss_kernel(logits_ref, labels_ref, o_ref, loss_acc, valid_acc):
    i = pl.program_id(0)

    @pl.when(i == 0)
    def _init():
        loss_acc[...] = jnp.zeros_like(loss_acc)
        valid_acc[...] = jnp.zeros_like(valid_acc)

    logits = logits_ref[...]                 # (tm, L_pad) f32, lane-dense
    labels = labels_ref[...]                 # (tm, 1) int32
    m = jnp.max(logits, axis=-1, keepdims=True)
    lse = jnp.log(jnp.sum(jnp.exp(logits - m), axis=-1, keepdims=True)) + m
    col = jax.lax.broadcasted_iota(jnp.int32, logits.shape, 1)
    tgt = jnp.sum(jnp.where(col == labels, logits, 0.0), axis=-1, keepdims=True)
    valid = (labels != -100).astype(jnp.float32)   # CrossEntropyLoss ignore_index
    loss_acc[...] = loss_acc[...] + jnp.sum((lse - tgt) * valid)
    valid_acc[...] = valid_acc[...] + jnp.sum(valid)

    @pl.when(i == pl.num_programs(0) - 1)
    def _finalize():
        # Direct division matches HF (NaN if no valid labels).
        o_ref[...] = loss_acc[...] / valid_acc[...]


def token_classification_loss(logits_pad, labels, *, tm=1024):
    M, L = logits_pad.shape
    tm = _fit(M, tm, 8)
    return pl.pallas_call(
        _ce_loss_kernel,
        out_shape=jax.ShapeDtypeStruct((1, 1), F32),
        grid=(M // tm,),
        in_specs=[
            pl.BlockSpec((tm, L), lambda i: (i, 0)),
            pl.BlockSpec((tm, 1), lambda i: (i, 0)),
        ],
        out_specs=pl.BlockSpec((1, 1), lambda i: (0, 0)),
        scratch_shapes=[pltpu.VMEM((1, 1), jnp.float32),
                        pltpu.VMEM((1, 1), jnp.float32)],
        compiler_params=pltpu.CompilerParams(
            dimension_semantics=("arbitrary",),
            vmem_limit_bytes=VMEM_LIMIT),
    )(logits_pad, labels.reshape(M, 1).astype(jnp.int32))


# ------------------------------ Model glue ----------------------------------


def init_params(key, *, vocab_size, hidden, num_layers, intermediate,
                max_pos, type_vocab, num_labels, num_heads):
    def nrm(k, shape):
        return jax.random.normal(k, shape, dtype=F32) * 0.02

    head_dim = hidden // num_heads
    scale = 1.0 / (head_dim ** 0.5)        # folded into Q projection

    # Classifier padded to a lane-dense 128-multiple; padded bias = -1e9 so the
    # padded classes get zero probability (CE over padded logits is unchanged).
    num_labels_pad = ((num_labels + 127) // 128) * 128
    keys = jax.random.split(key, 4 + num_layers)
    cls_w = nrm(keys[3], (hidden, num_labels))
    cls_w_pad = jnp.zeros((hidden, num_labels_pad), F32).at[:, :num_labels].set(cls_w)
    cls_b_pad = jnp.full((num_labels_pad,), NEG_INF, F32).at[:num_labels].set(0.0)

    p = {
        "word_emb": nrm(keys[0], (vocab_size, hidden)),
        "pos_emb": nrm(keys[1], (max_pos, hidden)),
        "type_emb": nrm(keys[2], (type_vocab, hidden)),
        "emb_ln_g": jnp.ones((hidden,), F32),
        "emb_ln_b": jnp.zeros((hidden,), F32),
        "classifier_w": cls_w_pad.astype(BF16),
        "classifier_b": cls_b_pad,
        "layers": [],
    }
    for li in range(num_layers):
        lk = jax.random.split(keys[4 + li], 6)
        wq = nrm(lk[0], (hidden, hidden)) * scale   # softmax scale folded in
        wk = nrm(lk[1], (hidden, hidden))
        wv = nrm(lk[2], (hidden, hidden))
        bq = jnp.zeros((hidden,), F32) * scale
        bk = jnp.zeros((hidden,), F32)
        bv = jnp.zeros((hidden,), F32)
        p["layers"].append({
            # Stacked QKV weight (H, 3H) -> single matmul, x read once.
            "wqkv": jnp.concatenate([wq, wk, wv], axis=1).astype(BF16),
            "bqkv": jnp.concatenate([bq, bk, bv]).reshape(1, 3 * hidden),
            "wo": nrm(lk[3], (hidden, hidden)).astype(BF16),
            "bo": jnp.zeros((hidden,), F32),
            "ln1_g": jnp.ones((hidden,), F32), "ln1_b": jnp.zeros((hidden,), F32),
            "w1": nrm(lk[4], (hidden, intermediate)).astype(BF16),
            "b1": jnp.zeros((intermediate,), F32),
            "w2": nrm(lk[5], (intermediate, hidden)).astype(BF16),
            "b2": jnp.zeros((hidden,), F32),
            "ln2_g": jnp.ones((hidden,), F32), "ln2_b": jnp.zeros((hidden,), F32),
        })
    return p


def bert_token_classification_forward(params, input_id, mask, label, *,
                                      num_heads, num_labels):
    B, S = input_id.shape
    hidden = params["word_emb"].shape[1]

    # Embedding lookups stay as XLA gathers (no clean Pallas gather here).
    # TODO(synk): token_type_ids assumed all-zero (HF default when not passed).
    emb = (params["word_emb"][input_id]
           + params["pos_emb"][:S][None, :, :]
           + params["type_emb"][0][None, None, :])
    x = layernorm(emb.reshape(B * S, hidden),
                  params["emb_ln_g"], params["emb_ln_b"])          # bf16

    # HF extended attention mask: (1 - mask) * large negative, shape (B, 1, S).
    mask_bias = ((1.0 - mask.astype(F32)) * NEG_INF).reshape(B, 1, S)

    for lp in params["layers"]:
        qkv = qkv_dense(x, lp["wqkv"], lp["bqkv"], hidden=hidden)  # (3,B*S,H) bf16
        ctx = flash_attention(qkv, mask_bias, batch=B, seq=S,
                              num_heads=num_heads)                 # (B*S,H) bf16
        x = dense_residual_layernorm(ctx, lp["wo"], lp["bo"], x,
                                     lp["ln1_g"], lp["ln1_b"])     # bf16
        h = dense(x, lp["w1"], lp["b1"], act="gelu")               # bf16
        x = dense_residual_layernorm(h, lp["w2"], lp["b2"], x,
                                     lp["ln2_g"], lp["ln2_b"])     # bf16

    logits_pad = dense(x, params["classifier_w"], params["classifier_b"],
                       out_dtype=F32)
    loss = token_classification_loss(logits_pad, label)[0, 0]
    logits = logits_pad[:, :num_labels].reshape(B, S, num_labels)
    # Matches HF `return_dict=False` output ordering: (loss, logits).
    return loss, logits


# --------------------------------- Main --------------------------------------

if __name__ == "__main__":
    B, S = 2, 8
    VOCAB, HIDDEN, HEADS, LAYERS, INTER = 50, 32, 2, 2, 64
    MAX_POS, TYPE_VOCAB, NUM_LABELS = 16, 2, 5

    key = jax.random.PRNGKey(0)
    kp, kid, klb = jax.random.split(key, 3)

    params = init_params(kp, vocab_size=VOCAB, hidden=HIDDEN, num_layers=LAYERS,
                         intermediate=INTER, max_pos=MAX_POS,
                         type_vocab=TYPE_VOCAB, num_labels=NUM_LABELS,
                         num_heads=HEADS)

    input_id = jax.random.randint(kid, (B, S), 0, VOCAB, dtype=jnp.int32)
    mask = jnp.array([[1, 1, 1, 1, 1, 1, 1, 1],
                      [1, 1, 1, 1, 1, 1, 0, 0]], dtype=jnp.int32)
    label = jax.random.randint(klb, (B, S), 0, NUM_LABELS, dtype=jnp.int32)
    label = jnp.where(mask == 1, label, -100)   # padded positions ignored in loss

    fwd = jax.jit(functools.partial(bert_token_classification_forward,
                                    num_heads=HEADS, num_labels=NUM_LABELS))
    loss, logits = fwd(params, input_id, mask, label)
    jax.block_until_ready((loss, logits))
    print("KERNEL_OK")
</pallas_src>

<mosaic_0001>
module attributes {stable_mosaic.version = 11 : i64} {
  func.func @_qkv_dense_kernel(%arg0: i32, %arg1: i32, %arg2: memref<16x32xbf16, #tpu.memory_space<vmem>>, %arg3: memref<32x96xbf16, #tpu.memory_space<vmem>>, %arg4: memref<1x96xf32, #tpu.memory_space<vmem>>, %arg5: memref<3x16x32xbf16, #tpu.memory_space<vmem>>, %arg6: memref<16x96xf32, #tpu.memory_space<vmem>>) attributes {dimension_semantics = [#tpu.dimension_semantics<parallel>, #tpu.dimension_semantics<arbitrary>], iteration_bounds = array<i64: 1, 1>, scalar_prefetch = 0 : i64, scratch_operands = 1 : i64, tpu.core_type = #tpu.core_type<tc>, window_params = [{transform_indices = @transform_0, window_bounds = array<i64: 16, 32>}, {transform_indices = @transform_1, window_bounds = array<i64: 32, 96>}, {pipeline_mode = #tpu.pipeline_mode<synchronous>, transform_indices = @transform_2, window_bounds = array<i64: 1, 96>}, {transform_indices = @transform_3, window_bounds = array<i64: 3, 16, 32>}]} {
    %c0_i32 = arith.constant 0 : i32
    %0 = arith.cmpi eq, %arg1, %c0_i32 : i32
    %1 = arith.extui %0 : i1 to i32
    %c0_i32_0 = arith.constant 0 : i32
    %2 = arith.cmpi ne, %1, %c0_i32_0 : i32
    scf.if %2 {
      %cst_10 = arith.constant 0.000000e+00 : f32
      %12 = vector.broadcast %cst_10 : f32 to vector<16x96xf32>
      %c0_11 = arith.constant 0 : index
      %c0_12 = arith.constant 0 : index
      %13 = vector.load %arg6[%c0_11, %c0_12] : memref<16x96xf32, #tpu.memory_space<vmem>>, vector<16x96xf32>
      tpu.vector_store %arg6[%c0_11, %c0_12], %12 {strides = array<i32>} : memref<16x96xf32, #tpu.memory_space<vmem>>, vector<16x96xf32>,
    } else {
    }
    %c0 = arith.constant 0 : index
    %c0_1 = arith.constant 0 : index
    %3 = vector.load %arg6[%c0, %c0_1] : memref<16x96xf32, #tpu.memory_space<vmem>>, vector<16x96xf32>
    %c0_2 = arith.constant 0 : index
    %c0_3 = arith.constant 0 : index
    %4 = vector.load %arg2[%c0_2, %c0_3] : memref<16x32xbf16, #tpu.memory_space<vmem>>, vector<16x32xbf16>
    %c0_4 = arith.constant 0 : index
    %c0_5 = arith.constant 0 : index
    %5 = vector.load %arg3[%c0_4, %c0_5] : memref<32x96xbf16, #tpu.memory_space<vmem>>, vector<32x96xbf16>
    %cst = arith.constant dense<0.000000e+00> : vector<16x96xf32>
    %6 = tpu.matmul %4, %5, %cst {dimension_numbers = #tpu.dot_dimension_numbers<[1], [0], [0], [1], [0, 0, 1, 1], [], []>} : vector<16x32xbf16>, vector<32x96xbf16>, vector<16x96xf32> -> vector<16x96xf32>
    %7 = arith.addf %3, %6 : vector<16x96xf32>
    %c0_6 = arith.constant 0 : index
    %c0_7 = arith.constant 0 : index
    %8 = vector.load %arg6[%c0_6, %c0_7] : memref<16x96xf32, #tpu.memory_space<vmem>>, vector<16x96xf32>
    tpu.vector_store %arg6[%c0_6, %c0_7], %7 {strides = array<i32>} : memref<16x96xf32, #tpu.memory_space<vmem>>, vector<16x96xf32>,
    %c0_i32_8 = arith.constant 0 : i32
    %9 = arith.cmpi eq, %arg1, %c0_i32_8 : i32
    %10 = arith.extui %9 : i1 to i32
    %c0_i32_9 = arith.constant 0 : i32
    %11 = arith.cmpi ne, %10, %c0_i32_9 : i32
    scf.if %11 {
      %c0_10 = arith.constant 0 : index
      %c0_11 = arith.constant 0 : index
      %12 = vector.load %arg6[%c0_10, %c0_11] : memref<16x96xf32, #tpu.memory_space<vmem>>, vector<16x96xf32>
      %c0_12 = arith.constant 0 : index
      %c0_13 = arith.constant 0 : index
      %13 = vector.load %arg4[%c0_12, %c0_13] : memref<1x96xf32, #tpu.memory_space<vmem>>, vector<1x96xf32>
      %14 = vector.broadcast %13 : vector<1x96xf32> to vector<16x96xf32>
      %15 = arith.addf %12, %14 : vector<16x96xf32>
      %16 = vector.extract_strided_slice %15 {offsets = [0, 0], sizes = [16, 32], strides = [1, 1]} : vector<16x96xf32> to vector<16x32xf32>
      %17 = arith.truncf %16 : vector<16x32xf32> to vector<16x32xbf16>
      %c0_14 = arith.constant 0 : index
      %c0_15 = arith.constant 0 : index
      %c0_16 = arith.constant 0 : index
      %18 = vector.load %arg5[%c0_14, %c0_15, %c0_16] : memref<3x16x32xbf16, #tpu.memory_space<vmem>>, vector<1x16x32xbf16>
      %19 = vector.shape_cast %18 : vector<1x16x32xbf16> to vector<16x32xbf16>
      %20 = vector.shape_cast %17 : vector<16x32xbf16> to vector<1x16x32xbf16>
      tpu.vector_store %arg5[%c0_14, %c0_15, %c0_16], %20 {strides = array<i32>} : memref<3x16x32xbf16, #tpu.memory_space<vmem>>, vector<1x16x32xbf16>,
      %21 = vector.extract_strided_slice %15 {offsets = [0, 32], sizes = [16, 32], strides = [1, 1]} : vector<16x96xf32> to vector<16x32xf32>
      %22 = arith.truncf %21 : vector<16x32xf32> to vector<16x32xbf16>
      %c1 = arith.constant 1 : index
      %c0_17 = arith.constant 0 : index
      %c0_18 = arith.constant 0 : index
      %23 = vector.load %arg5[%c1, %c0_17, %c0_18] : memref<3x16x32xbf16, #tpu.memory_space<vmem>>, vector<1x16x32xbf16>
      %24 = vector.shape_cast %23 : vector<1x16x32xbf16> to vector<16x32xbf16>
      %25 = vector.shape_cast %22 : vector<16x32xbf16> to vector<1x16x32xbf16>
      tpu.vector_store %arg5[%c1, %c0_17, %c0_18], %25 {strides = array<i32>} : memref<3x16x32xbf16, #tpu.memory_space<vmem>>, vector<1x16x32xbf16>,
      %26 = vector.extract_strided_slice %15 {offsets = [0, 64], sizes = [16, 32], strides = [1, 1]} : vector<16x96xf32> to vector<16x32xf32>
      %27 = arith.truncf %26 : vector<16x32xf32> to vector<16x32xbf16>
      %c2 = arith.constant 2 : index
      %c0_19 = arith.constant 0 : index
      %c0_20 = arith.constant 0 : index
      %28 = vector.load %arg5[%c2, %c0_19, %c0_20] : memref<3x16x32xbf16, #tpu.memory_space<vmem>>, vector<1x16x32xbf16>
      %29 = vector.shape_cast %28 : vector<1x16x32xbf16> to vector<16x32xbf16>
      %30 = vector.shape_cast %27 : vector<16x32xbf16> to vector<1x16x32xbf16>
      tpu.vector_store %arg5[%c2, %c0_19, %c0_20], %30 {strides = array<i32>} : memref<3x16x32xbf16, #tpu.memory_space<vmem>>, vector<1x16x32xbf16>,
    } else {
    }
    return
  }
  func.func @transform_0(%arg0: i32, %arg1: i32) -> (i32, i32) {
    %c0_i32 = arith.constant 0 : i32
    return %arg0, %arg1 : i32, i32
  }
  func.func @transform_1(%arg0: i32, %arg1: i32) -> (i32, i32) {
    %c0_i32 = arith.constant 0 : i32
    %c0_i32_0 = arith.constant 0 : i32
    return %arg1, %c0_i32 : i32, i32
  }
  func.func @transform_2(%arg0: i32, %arg1: i32) -> (i32, i32) {
    %c0_i32 = arith.constant 0 : i32
    %c0_i32_0 = arith.constant 0 : i32
    %c0_i32_1 = arith.constant 0 : i32
    return %c0_i32, %c0_i32_0 : i32, i32
  }
  func.func @transform_3(%arg0: i32, %arg1: i32) -> (i32, i32, i32) {
    %c0_i32 = arith.constant 0 : i32
    %c0_i32_0 = arith.constant 0 : i32
    %c0_i32_1 = arith.constant 0 : i32
    return %c0_i32, %arg0, %c0_i32_0 : i32, i32, i32
  }
}

module attributes {stable_mosaic.version = 11 : i64} {
  func.func @_layernorm_kernel(%arg0: i32, %arg1: memref<16x32xf32, #tpu.memory_space<vmem>>, %arg2: memref<1x32xf32, #tpu.memory_space<vmem>>, %arg3: memref<1x32xf32, #tpu.memory_space<vmem>>, %arg4: memref<16x32xbf16, #tpu.memory_space<vmem>>) attributes {dimension_semantics = [#tpu.dimension_semantics<parallel>], iteration_bounds = array<i64: 1>, scalar_prefetch = 0 : i64, scratch_operands = 0 : i64, tpu.core_type = #tpu.core_type<tc>, window_params = [{transform_indices = @transform_0, window_bounds = array<i64: 16, 32>}, {pipeline_mode = #tpu.pipeline_mode<synchronous>, transform_indices = @transform_1, window_bounds = array<i64: 1, 32>}, {pipeline_mode = #tpu.pipeline_mode<synchronous>, transform_indices = @transform_2, window_bounds = array<i64: 1, 32>}, {transform_indices = @transform_3, window_bounds = array<i64: 16, 32>}]} {
    %c0 = arith.constant 0 : index
    %c0_0 = arith.constant 0 : index
    %0 = vector.load %arg1[%c0, %c0_0] : memref<16x32xf32, #tpu.memory_space<vmem>>, vector<16x32xf32>
    %cst = arith.constant dense<0.000000e+00> : vector<16xf32>
    %1 = vector.multi_reduction <add>, %0, %cst [1] : vector<16x32xf32> to vector<16xf32>
    %2 = vector.shape_cast %1 : vector<16xf32> to vector<16x1xf32>
    %cst_1 = arith.constant 3.200000e+01 : f32
    %3 = vector.broadcast %cst_1 : f32 to vector<16x1xf32>
    %4 = arith.divf %2, %3 : vector<16x1xf32>
    %5 = vector.broadcast %4 : vector<16x1xf32> to vector<16x32xf32>
    %6 = arith.subf %0, %5 : vector<16x32xf32>
    %7 = arith.mulf %6, %6 : vector<16x32xf32>
    %cst_2 = arith.constant dense<0.000000e+00> : vector<16xf32>
    %8 = vector.multi_reduction <add>, %7, %cst_2 [1] : vector<16x32xf32> to vector<16xf32>
    %9 = vector.shape_cast %8 : vector<16xf32> to vector<16x1xf32>
    %cst_3 = arith.constant 3.200000e+01 : f32
    %10 = vector.broadcast %cst_3 : f32 to vector<16x1xf32>
    %11 = arith.divf %9, %10 : vector<16x1xf32>
    %12 = vector.broadcast %4 : vector<16x1xf32> to vector<16x32xf32>
    %13 = arith.subf %0, %12 : vector<16x32xf32>
    %cst_4 = arith.constant 9.99999996E-13 : f32
    %14 = vector.broadcast %cst_4 : f32 to vector<16x1xf32>
    %15 = arith.addf %11, %14 : vector<16x1xf32>
    %16 = math.rsqrt %15 : vector<16x1xf32>
    %17 = vector.broadcast %16 : vector<16x1xf32> to vector<16x32xf32>
    %18 = arith.mulf %13, %17 : vector<16x32xf32>
    %c0_5 = arith.constant 0 : index
    %c0_6 = arith.constant 0 : index
    %19 = vector.load %arg2[%c0_5, %c0_6] : memref<1x32xf32, #tpu.memory_space<vmem>>, vector<1x32xf32>
    %20 = vector.broadcast %19 : vector<1x32xf32> to vector<16x32xf32>
    %21 = arith.mulf %18, %20 : vector<16x32xf32>
    %c0_7 = arith.constant 0 : index
    %c0_8 = arith.constant 0 : index
    %22 = vector.load %arg3[%c0_7, %c0_8] : memref<1x32xf32, #tpu.memory_space<vmem>>, vector<1x32xf32>
    %23 = vector.broadcast %22 : vector<1x32xf32> to vector<16x32xf32>
    %24 = arith.addf %21, %23 : vector<16x32xf32>
    %25 = arith.truncf %24 : vector<16x32xf32> to vector<16x32xbf16>
    %c0_9 = arith.constant 0 : index
    %c0_10 = arith.constant 0 : index
    %26 = vector.load %arg4[%c0_9, %c0_10] : memref<16x32xbf16, #tpu.memory_space<vmem>>, vector<16x32xbf16>
    tpu.vector_store %arg4[%c0_9, %c0_10], %25 {strides = array<i32>} : memref<16x32xbf16, #tpu.memory_space<vmem>>, vector<16x32xbf16>,
    return
  }
  func.func @transform_0(%arg0: i32) -> (i32, i32) {
    %c0_i32 = arith.constant 0 : i32
    %c0_i32_0 = arith.constant 0 : i32
    return %arg0, %c0_i32 : i32, i32
  }
  func.func @transform_1(%arg0: i32) -> (i32, i32) {
    %c0_i32 = arith.constant 0 : i32
    %c0_i32_0 = arith.constant 0 : i32
    %c0_i32_1 = arith.constant 0 : i32
    return %c0_i32, %c0_i32_0 : i32, i32
  }
  func.func @transform_2(%arg0: i32) -> (i32, i32) {
    %c0_i32 = arith.constant 0 : i32
    %c0_i32_0 = arith.constant 0 : i32
    %c0_i32_1 = arith.constant 0 : i32
    return %c0_i32, %c0_i32_0 : i32, i32
  }
  func.func @transform_3(%arg0: i32) -> (i32, i32) {
    %c0_i32 = arith.constant 0 : i32
    %c0_i32_0 = arith.constant 0 : i32
    return %arg0, %c0_i32 : i32, i32
  }
}

module attributes {stable_mosaic.version = 11 : i64} {
  func.func @_flash_attention_kernel(%arg0: i32, %arg1: i32, %arg2: i32, %arg3: memref<1x8x32xbf16, #tpu.memory_space<vmem>>, %arg4: memref<1x8x32xbf16, #tpu.memory_space<vmem>>, %arg5: memref<1x8x32xbf16, #tpu.memory_space<vmem>>, %arg6: memref<1x1x8xf32, #tpu.memory_space<vmem>>, %arg7: memref<8x32xbf16, #tpu.memory_space<vmem>>, %arg8: memref<8x2xf32, #tpu.memory_space<vmem>>, %arg9: memref<8x2xf32, #tpu.memory_space<vmem>>, %arg10: memref<8x32xf32, #tpu.memory_space<vmem>>) attributes {dimension_semantics = [#tpu.dimension_semantics<parallel>, #tpu.dimension_semantics<parallel>, #tpu.dimension_semantics<arbitrary>], iteration_bounds = array<i64: 2, 1, 1>, scalar_prefetch = 0 : i64, scratch_operands = 3 : i64, tpu.core_type = #tpu.core_type<tc>, window_params = [{transform_indices = @transform_0, window_bounds = array<i64: 1, 8, 32>}, {transform_indices = @transform_1, window_bounds = array<i64: 1, 8, 32>}, {transform_indices = @transform_2, window_bounds = array<i64: 1, 8, 32>}, {transform_indices = @transform_3, window_bounds = array<i64: 1, 1, 8>}, {transform_indices = @transform_4, window_bounds = array<i64: 8, 32>}]} {
    %c0_i32 = arith.constant 0 : i32
    %0 = arith.cmpi eq, %arg2, %c0_i32 : i32
    %1 = arith.extui %0 : i1 to i32
    %c0_i32_0 = arith.constant 0 : i32
    %2 = arith.cmpi ne, %1, %c0_i32_0 : i32
    scf.if %2 {
      %cst_52 = arith.constant -1.000000e+30 : f32
      %72 = vector.broadcast %cst_52 : f32 to vector<8x2xf32>
      %c0_53 = arith.constant 0 : index
      %c0_54 = arith.constant 0 : index
      %73 = vector.load %arg8[%c0_53, %c0_54] : memref<8x2xf32, #tpu.memory_space<vmem>>, vector<8x2xf32>
      tpu.vector_store %arg8[%c0_53, %c0_54], %72 {strides = array<i32>} : memref<8x2xf32, #tpu.memory_space<vmem>>, vector<8x2xf32>,
      %cst_55 = arith.constant 0.000000e+00 : f32
      %74 = vector.broadcast %cst_55 : f32 to vector<8x2xf32>
      %c0_56 = arith.constant 0 : index
      %c0_57 = arith.constant 0 : index
      %75 = vector.load %arg9[%c0_56, %c0_57] : memref<8x2xf32, #tpu.memory_space<vmem>>, vector<8x2xf32>
      tpu.vector_store %arg9[%c0_56, %c0_57], %74 {strides = array<i32>} : memref<8x2xf32, #tpu.memory_space<vmem>>, vector<8x2xf32>,
      %cst_58 = arith.constant 0.000000e+00 : f32
      %76 = vector.broadcast %cst_58 : f32 to vector<8x32xf32>
      %c0_59 = arith.constant 0 : index
      %c0_60 = arith.constant 0 : index
      %77 = vector.load %arg10[%c0_59, %c0_60] : memref<8x32xf32, #tpu.memory_space<vmem>>, vector<8x32xf32>
      tpu.vector_store %arg10[%c0_59, %c0_60], %76 {strides = array<i32>} : memref<8x32xf32, #tpu.memory_space<vmem>>, vector<8x32xf32>,
    } else {
    }
    %c0 = arith.constant 0 : index
    %c0_1 = arith.constant 0 : index
    %c0_2 = arith.constant 0 : index
    %3 = vector.load %arg6[%c0, %c0_1, %c0_2] : memref<1x1x8xf32, #tpu.memory_space<vmem>>, vector<1x1x8xf32>
    %4 = vector.shape_cast %3 : vector<1x1x8xf32> to vector<1x8xf32>
    %c0_3 = arith.constant 0 : index
    %c0_4 = arith.constant 0 : index
    %c0_5 = arith.constant 0 : index
    %5 = vector.load %arg3[%c0_3, %c0_4, %c0_5] : memref<1x8x32xbf16, #tpu.memory_space<vmem>>, vector<1x8x16xbf16>
    %6 = vector.shape_cast %5 : vector<1x8x16xbf16> to vector<8x16xbf16>
    %c0_6 = arith.constant 0 : index
    %c0_7 = arith.constant 0 : index
    %c0_8 = arith.constant 0 : index
    %7 = vector.load %arg4[%c0_6, %c0_7, %c0_8] : memref<1x8x32xbf16, #tpu.memory_space<vmem>>, vector<1x8x16xbf16>
    %8 = vector.shape_cast %7 : vector<1x8x16xbf16> to vector<8x16xbf16>
    %cst = arith.constant dense<0.000000e+00> : vector<8x8xf32>
    %9 = tpu.matmul %6, %8, %cst {dimension_numbers = #tpu.dot_dimension_numbers<[1], [1], [0], [0], [0, 0, 1, 0], [], []>} : vector<8x16xbf16>, vector<8x16xbf16>, vector<8x8xf32> -> vector<8x8xf32>
    %10 = vector.broadcast %4 : vector<1x8xf32> to vector<8x8xf32>
    %11 = arith.addf %9, %10 : vector<8x8xf32>
    %c0_9 = arith.constant 0 : index
    %c0_10 = arith.constant 0 : index
    %12 = vector.load %arg8[%c0_9, %c0_10] : memref<8x2xf32, #tpu.memory_space<vmem>>, vector<8x1xf32>
    %c0_11 = arith.constant 0 : index
    %c0_12 = arith.constant 0 : index
    %13 = vector.load %arg9[%c0_11, %c0_12] : memref<8x2xf32, #tpu.memory_space<vmem>>, vector<8x1xf32>
    %cst_13 = arith.constant dense<0xFF800000> : vector<8xf32>
    %14 = vector.multi_reduction <maximumf>, %11, %cst_13 [1] : vector<8x8xf32> to vector<8xf32>
    %15 = vector.shape_cast %14 : vector<8xf32> to vector<8x1xf32>
    %16 = arith.maximumf %12, %15 : vector<8x1xf32>
    %17 = arith.subf %12, %16 : vector<8x1xf32>
    %18 = math.exp %17 : vector<8x1xf32>
    %19 = vector.broadcast %16 : vector<8x1xf32> to vector<8x8xf32>
    %20 = arith.subf %11, %19 : vector<8x8xf32>
    %21 = math.exp %20 : vector<8x8xf32>
    %22 = arith.mulf %18, %13 : vector<8x1xf32>
    %cst_14 = arith.constant dense<0.000000e+00> : vector<8xf32>
    %23 = vector.multi_reduction <add>, %21, %cst_14 [1] : vector<8x8xf32> to vector<8xf32>
    %24 = vector.shape_cast %23 : vector<8xf32> to vector<8x1xf32>
    %25 = arith.addf %22, %24 : vector<8x1xf32>
    %c0_15 = arith.constant 0 : index
    %c0_16 = arith.constant 0 : index
    %26 = vector.load %arg9[%c0_15, %c0_16] : memref<8x2xf32, #tpu.memory_space<vmem>>, vector<8x1xf32>
    tpu.vector_store %arg9[%c0_15, %c0_16], %25 {strides = array<i32>} : memref<8x2xf32, #tpu.memory_space<vmem>>, vector<8x1xf32>,
    %c0_17 = arith.constant 0 : index
    %c0_18 = arith.constant 0 : index
    %27 = vector.load %arg10[%c0_17, %c0_18] : memref<8x32xf32, #tpu.memory_space<vmem>>, vector<8x16xf32>
    %28 = vector.broadcast %18 : vector<8x1xf32> to vector<8x16xf32>
    %29 = arith.mulf %28, %27 : vector<8x16xf32>
    %30 = arith.truncf %21 : vector<8x8xf32> to vector<8x8xbf16>
    %c0_19 = arith.constant 0 : index
    %c0_20 = arith.constant 0 : index
    %c0_21 = arith.constant 0 : index
    %31 = vector.load %arg5[%c0_19, %c0_20, %c0_21] : memref<1x8x32xbf16, #tpu.memory_space<vmem>>, vector<1x8x16xbf16>
    %32 = vector.shape_cast %31 : vector<1x8x16xbf16> to vector<8x16xbf16>
    %cst_22 = arith.constant dense<0.000000e+00> : vector<8x16xf32>
    %33 = tpu.matmul %30, %32, %cst_22 {dimension_numbers = #tpu.dot_dimension_numbers<[1], [0], [0], [1], [0, 0, 1, 1], [], []>} : vector<8x8xbf16>, vector<8x16xbf16>, vector<8x16xf32> -> vector<8x16xf32>
    %34 = arith.addf %29, %33 : vector<8x16xf32>
    %c0_23 = arith.constant 0 : index
    %c0_24 = arith.constant 0 : index
    %35 = vector.load %arg10[%c0_23, %c0_24] : memref<8x32xf32, #tpu.memory_space<vmem>>, vector<8x16xf32>
    tpu.vector_store %arg10[%c0_23, %c0_24], %34 {strides = array<i32>} : memref<8x32xf32, #tpu.memory_space<vmem>>, vector<8x16xf32>,
    %c0_25 = arith.constant 0 : index
    %c0_26 = arith.constant 0 : index
    %36 = vector.load %arg8[%c0_25, %c0_26] : memref<8x2xf32, #tpu.memory_space<vmem>>, vector<8x1xf32>
    tpu.vector_store %arg8[%c0_25, %c0_26], %16 {strides = array<i32>} : memref<8x2xf32, #tpu.memory_space<vmem>>, vector<8x1xf32>,
    %c0_27 = arith.constant 0 : index
    %c0_28 = arith.constant 0 : index
    %c16 = arith.constant 16 : index
    %37 = vector.load %arg3[%c0_27, %c0_28, %c16] : memref<1x8x32xbf16, #tpu.memory_space<vmem>>, vector<1x8x16xbf16>
    %38 = vector.shape_cast %37 : vector<1x8x16xbf16> to vector<8x16xbf16>
    %c0_29 = arith.constant 0 : index
    %c0_30 = arith.constant 0 : index
    %c16_31 = arith.constant 16 : index
    %39 = vector.load %arg4[%c0_29, %c0_30, %c16_31] : memref<1x8x32xbf16, #tpu.memory_space<vmem>>, vector<1x8x16xbf16>
    %40 = vector.shape_cast %39 : vector<1x8x16xbf16> to vector<8x16xbf16>
    %cst_32 = arith.constant dense<0.000000e+00> : vector<8x8xf32>
    %41 = tpu.matmul %38, %40, %cst_32 {dimension_numbers = #tpu.dot_dimension_numbers<[1], [1], [0], [0], [0, 0, 1, 0], [], []>} : vector<8x16xbf16>, vector<8x16xbf16>, vector<8x8xf32> -> vector<8x8xf32>
    %42 = vector.broadcast %4 : vector<1x8xf32> to vector<8x8xf32>
    %43 = arith.addf %41, %42 : vector<8x8xf32>
    %c0_33 = arith.constant 0 : index
    %c1 = arith.constant 1 : index
    %44 = vector.load %arg8[%c0_33, %c1] : memref<8x2xf32, #tpu.memory_space<vmem>>, vector<8x1xf32>
    %c0_34 = arith.constant 0 : index
    %c1_35 = arith.constant 1 : index
    %45 = vector.load %arg9[%c0_34, %c1_35] : memref<8x2xf32, #tpu.memory_space<vmem>>, vector<8x1xf32>
    %cst_36 = arith.constant dense<0xFF800000> : vector<8xf32>
    %46 = vector.multi_reduction <maximumf>, %43, %cst_36 [1] : vector<8x8xf32> to vector<8xf32>
    %47 = vector.shape_cast %46 : vector<8xf32> to vector<8x1xf32>
    %48 = arith.maximumf %44, %47 : vector<8x1xf32>
    %49 = arith.subf %44, %48 : vector<8x1xf32>
    %50 = math.exp %49 : vector<8x1xf32>
    %51 = vector.broadcast %48 : vector<8x1xf32> to vector<8x8xf32>
    %52 = arith.subf %43, %51 : vector<8x8xf32>
    %53 = math.exp %52 : vector<8x8xf32>
    %54 = arith.mulf %50, %45 : vector<8x1xf32>
    %cst_37 = arith.constant dense<0.000000e+00> : vector<8xf32>
    %55 = vector.multi_reduction <add>, %53, %cst_37 [1] : vector<8x8xf32> to vector<8xf32>
    %56 = vector.shape_cast %55 : vector<8xf32> to vector<8x1xf32>
    %57 = arith.addf %54, %56 : vector<8x1xf32>
    %c0_38 = arith.constant 0 : index
    %c1_39 = arith.constant 1 : index
    %58 = vector.load %arg9[%c0_38, %c1_39] : memref<8x2xf32, #tpu.memory_space<vmem>>, vector<8x1xf32>
    tpu.vector_store %arg9[%c0_38, %c1_39], %57 {strides = array<i32>} : memref<8x2xf32, #tpu.memory_space<vmem>>, vector<8x1xf32>,
    %c0_40 = arith.constant 0 : index
    %c16_41 = arith.constant 16 : index
    %59 = vector.load %arg10[%c0_40, %c16_41] : memref<8x32xf32, #tpu.memory_space<vmem>>, vector<8x16xf32>
    %60 = vector.broadcast %50 : vector<8x1xf32> to vector<8x16xf32>
    %61 = arith.mulf %60, %59 : vector<8x16xf32>
    %62 = arith.truncf %53 : vector<8x8xf32> to vector<8x8xbf16>
    %c0_42 = arith.constant 0 : index
    %c0_43 = arith.constant 0 : index
    %c16_44 = arith.constant 16 : index
    %63 = vector.load %arg5[%c0_42, %c0_43, %c16_44] : memref<1x8x32xbf16, #tpu.memory_space<vmem>>, vector<1x8x16xbf16>
    %64 = vector.shape_cast %63 : vector<1x8x16xbf16> to vector<8x16xbf16>
    %cst_45 = arith.constant dense<0.000000e+00> : vector<8x16xf32>
    %65 = tpu.matmul %62, %64, %cst_45 {dimension_numbers = #tpu.dot_dimension_numbers<[1], [0], [0], [1], [0, 0, 1, 1], [], []>} : vector<8x8xbf16>, vector<8x16xbf16>, vector<8x16xf32> -> vector<8x16xf32>
    %66 = arith.addf %61, %65 : vector<8x16xf32>
    %c0_46 = arith.constant 0 : index
    %c16_47 = arith.constant 16 : index
    %67 = vector.load %arg10[%c0_46, %c16_47] : memref<8x32xf32, #tpu.memory_space<vmem>>, vector<8x16xf32>
    tpu.vector_store %arg10[%c0_46, %c16_47], %66 {strides = array<i32>} : memref<8x32xf32, #tpu.memory_space<vmem>>, vector<8x16xf32>,
    %c0_48 = arith.constant 0 : index
    %c1_49 = arith.constant 1 : index
    %68 = vector.load %arg8[%c0_48, %c1_49] : memref<8x2xf32, #tpu.memory_space<vmem>>, vector<8x1xf32>
    tpu.vector_store %arg8[%c0_48, %c1_49], %48 {strides = array<i32>} : memref<8x2xf32, #tpu.memory_space<vmem>>, vector<8x1xf32>,
    %c0_i32_50 = arith.constant 0 : i32
    %69 = arith.cmpi eq, %arg2, %c0_i32_50 : i32
    %70 = arith.extui %69 : i1 to i32
    %c0_i32_51 = arith.constant 0 : i32
    %71 = arith.cmpi ne, %70, %c0_i32_51 : i32
    scf.if %71 {
      %c0_52 = arith.constant 0 : index
      %c0_53 = arith.constant 0 : index
      %72 = vector.load %arg9[%c0_52, %c0_53] : memref<8x2xf32, #tpu.memory_space<vmem>>, vector<8x2xf32>
      %73 = tpu.reciprocal %72 {approx = true} : vector<8x2xf32> -> vector<8x2xf32>
      %c0_54 = arith.constant 0 : index
      %c0_55 = arith.constant 0 : index
      %74 = vector.load %arg10[%c0_54, %c0_55] : memref<8x32xf32, #tpu.memory_space<vmem>>, vector<8x16xf32>
      %75 = vector.extract_strided_slice %73 {offsets = [0, 0], sizes = [8, 1], strides = [1, 1]} : vector<8x2xf32> to vector<8x1xf32>
      %76 = vector.broadcast %75 : vector<8x1xf32> to vector<8x16xf32>
      %77 = arith.mulf %74, %76 : vector<8x16xf32>
      %c0_56 = arith.constant 0 : index
      %c0_57 = arith.constant 0 : index
      %78 = vector.load %arg10[%c0_56, %c0_57] : memref<8x32xf32, #tpu.memory_space<vmem>>, vector<8x16xf32>
      tpu.vector_store %arg10[%c0_56, %c0_57], %77 {strides = array<i32>} : memref<8x32xf32, #tpu.memory_space<vmem>>, vector<8x16xf32>,
      %c0_58 = arith.constant 0 : index
      %c16_59 = arith.constant 16 : index
      %79 = vector.load %arg10[%c0_58, %c16_59] : memref<8x32xf32, #tpu.memory_space<vmem>>, vector<8x16xf32>
      %80 = vector.extract_strided_slice %73 {offsets = [0, 1], sizes = [8, 1], strides = [1, 1]} : vector<8x2xf32> to vector<8x1xf32>
      %81 = vector.broadcast %80 : vector<8x1xf32> to vector<8x16xf32>
      %82 = arith.mulf %79, %81 : vector<8x16xf32>
      %c0_60 = arith.constant 0 : index
      %c16_61 = arith.constant 16 : index
      %83 = vector.load %arg10[%c0_60, %c16_61] : memref<8x32xf32, #tpu.memory_space<vmem>>, vector<8x16xf32>
      tpu.vector_store %arg10[%c0_60, %c16_61], %82 {strides = array<i32>} : memref<8x32xf32, #tpu.memory_space<vmem>>, vector<8x16xf32>,
      %c0_62 = arith.constant 0 : index
      %c0_63 = arith.constant 0 : index
      %84 = vector.load %arg10[%c0_62, %c0_63] : memref<8x32xf32, #tpu.memory_space<vmem>>, vector<8x32xf32>
      %85 = arith.truncf %84 : vector<8x32xf32> to vector<8x32xbf16>
      %c0_64 = arith.constant 0 : index
      %c0_65 = arith.constant 0 : index
      %86 = vector.load %arg7[%c0_64, %c0_65] : memref<8x32xbf16, #tpu.memory_space<vmem>>, vector<8x32xbf16>
      tpu.vector_store %arg7[%c0_64, %c0_65], %85 {strides = array<i32>} : memref<8x32xbf16, #tpu.memory_space<vmem>>, vector<8x32xbf16>,
    } else {
    }
    return
  }
  func.func @transform_0(%arg0: i32, %arg1: i32, %arg2: i32) -> (i32, i32, i32) {
    %c1_i32 = arith.constant 1 : i32
    %0 = arith.muli %arg0, %c1_i32 : i32
    %1 = arith.addi %0, %arg1 : i32
    %c0_i32 = arith.constant 0 : i32
    %c0_i32_0 = arith.constant 0 : i32
    %c0_i32_1 = arith.constant 0 : i32
    return %c0_i32, %1, %c0_i32_0 : i32, i32, i32
  }
  func.func @transform_1(%arg0: i32, %arg1: i32, %arg2: i32) -> (i32, i32, i32) {
    %c1_i32 = arith.constant 1 : i32
    %0 = arith.muli %arg0, %c1_i32 : i32
    %1 = arith.addi %0, %arg2 : i32
    %c1_i32_0 = arith.constant 1 : i32
    %c0_i32 = arith.constant 0 : i32
    %c0_i32_1 = arith.constant 0 : i32
    return %c1_i32_0, %1, %c0_i32 : i32, i32, i32
  }
  func.func @transform_2(%arg0: i32, %arg1: i32, %arg2: i32) -> (i32, i32, i32) {
    %c1_i32 = arith.constant 1 : i32
    %0 = arith.muli %arg0, %c1_i32 : i32
    %1 = arith.addi %0, %arg2 : i32
    %c2_i32 = arith.constant 2 : i32
    %c0_i32 = arith.constant 0 : i32
    %c0_i32_0 = arith.constant 0 : i32
    return %c2_i32, %1, %c0_i32 : i32, i32, i32
  }
  func.func @transform_3(%arg0: i32, %arg1: i32, %arg2: i32) -> (i32, i32, i32) {
    %c0_i32 = arith.constant 0 : i32
    %c0_i32_0 = arith.constant 0 : i32
    return %arg0, %c0_i32, %arg2 : i32, i32, i32
  }
  func.func @transform_4(%arg0: i32, %arg1: i32, %arg2: i32) -> (i32, i32) {
    %c1_i32 = arith.constant 1 : i32
    %0 = arith.muli %arg0, %c1_i32 : i32
    %1 = arith.addi %0, %arg1 : i32
    %c0_i32 = arith.constant 0 : i32
    %c0_i32_0 = arith.constant 0 : i32
    return %1, %c0_i32 : i32, i32
  }
}

module attributes {stable_mosaic.version = 11 : i64} {
  func.func @_dense_res_ln_kernel(%arg0: i32, %arg1: i32, %arg2: memref<16x32xbf16, #tpu.memory_space<vmem>>, %arg3: memref<32x32xbf16, #tpu.memory_space<vmem>>, %arg4: memref<1x32xf32, #tpu.memory_space<vmem>>, %arg5: memref<16x32xbf16, #tpu.memory_space<vmem>>, %arg6: memref<1x32xf32, #tpu.memory_space<vmem>>, %arg7: memref<1x32xf32, #tpu.memory_space<vmem>>, %arg8: memref<16x32xbf16, #tpu.memory_space<vmem>>, %arg9: memref<16x32xf32, #tpu.memory_space<vmem>>) attributes {dimension_semantics = [#tpu.dimension_semantics<parallel>, #tpu.dimension_semantics<arbitrary>], iteration_bounds = array<i64: 1, 1>, scalar_prefetch = 0 : i64, scratch_operands = 1 : i64, tpu.core_type = #tpu.core_type<tc>, window_params = [{transform_indices = @transform_0, window_bounds = array<i64: 16, 32>}, {transform_indices = @transform_1, window_bounds = array<i64: 32, 32>}, {pipeline_mode = #tpu.pipeline_mode<synchronous>, transform_indices = @transform_2, window_bounds = array<i64: 1, 32>}, {transform_indices = @transform_3, window_bounds = array<i64: 16, 32>}, {pipeline_mode = #tpu.pipeline_mode<synchronous>, transform_indices = @transform_4, window_bounds = array<i64: 1, 32>}, {pipeline_mode = #tpu.pipeline_mode<synchronous>, transform_indices = @transform_5, window_bounds = array<i64: 1, 32>}, {transform_indices = @transform_6, window_bounds = array<i64: 16, 32>}]} {
    %c0_i32 = arith.constant 0 : i32
    %0 = arith.cmpi eq, %arg1, %c0_i32 : i32
    %1 = arith.extui %0 : i1 to i32
    %c0_i32_0 = arith.constant 0 : i32
    %2 = arith.cmpi ne, %1, %c0_i32_0 : i32
    scf.if %2 {
      %cst_10 = arith.constant 0.000000e+00 : f32
      %12 = vector.broadcast %cst_10 : f32 to vector<16x32xf32>
      %c0_11 = arith.constant 0 : index
      %c0_12 = arith.constant 0 : index
      %13 = vector.load %arg9[%c0_11, %c0_12] : memref<16x32xf32, #tpu.memory_space<vmem>>, vector<16x32xf32>
      tpu.vector_store %arg9[%c0_11, %c0_12], %12 {strides = array<i32>} : memref<16x32xf32, #tpu.memory_space<vmem>>, vector<16x32xf32>,
    } else {
    }
    %c0 = arith.constant 0 : index
    %c0_1 = arith.constant 0 : index
    %3 = vector.load %arg9[%c0, %c0_1] : memref<16x32xf32, #tpu.memory_space<vmem>>, vector<16x32xf32>
    %c0_2 = arith.constant 0 : index
    %c0_3 = arith.constant 0 : index
    %4 = vector.load %arg2[%c0_2, %c0_3] : memref<16x32xbf16, #tpu.memory_space<vmem>>, vector<16x32xbf16>
    %c0_4 = arith.constant 0 : index
    %c0_5 = arith.constant 0 : index
    %5 = vector.load %arg3[%c0_4, %c0_5] : memref<32x32xbf16, #tpu.memory_space<vmem>>, vector<32x32xbf16>
    %cst = arith.constant dense<0.000000e+00> : vector<16x32xf32>
    %6 = tpu.matmul %4, %5, %cst {dimension_numbers = #tpu.dot_dimension_numbers<[1], [0], [0], [1], [0, 0, 1, 1], [], []>} : vector<16x32xbf16>, vector<32x32xbf16>, vector<16x32xf32> -> vector<16x32xf32>
    %7 = arith.addf %3, %6 : vector<16x32xf32>
    %c0_6 = arith.constant 0 : index
    %c0_7 = arith.constant 0 : index
    %8 = vector.load %arg9[%c0_6, %c0_7] : memref<16x32xf32, #tpu.memory_space<vmem>>, vector<16x32xf32>
    tpu.vector_store %arg9[%c0_6, %c0_7], %7 {strides = array<i32>} : memref<16x32xf32, #tpu.memory_space<vmem>>, vector<16x32xf32>,
    %c0_i32_8 = arith.constant 0 : i32
    %9 = arith.cmpi eq, %arg1, %c0_i32_8 : i32
    %10 = arith.extui %9 : i1 to i32
    %c0_i32_9 = arith.constant 0 : i32
    %11 = arith.cmpi ne, %10, %c0_i32_9 : i32
    scf.if %11 {
      %c0_10 = arith.constant 0 : index
      %c0_11 = arith.constant 0 : index
      %12 = vector.load %arg9[%c0_10, %c0_11] : memref<16x32xf32, #tpu.memory_space<vmem>>, vector<16x32xf32>
      %c0_12 = arith.constant 0 : index
      %c0_13 = arith.constant 0 : index
      %13 = vector.load %arg4[%c0_12, %c0_13] : memref<1x32xf32, #tpu.memory_space<vmem>>, vector<1x32xf32>
      %14 = vector.broadcast %13 : vector<1x32xf32> to vector<16x32xf32>
      %15 = arith.addf %12, %14 : vector<16x32xf32>
      %c0_14 = arith.constant 0 : index
      %c0_15 = arith.constant 0 : index
      %16 = vector.load %arg5[%c0_14, %c0_15] : memref<16x32xbf16, #tpu.memory_space<vmem>>, vector<16x32xbf16>
      %17 = arith.extf %16 : vector<16x32xbf16> to vector<16x32xf32>
      %18 = arith.addf %15, %17 : vector<16x32xf32>
      %cst_16 = arith.constant dense<0.000000e+00> : vector<16xf32>
      %19 = vector.multi_reduction <add>, %18, %cst_16 [1] : vector<16x32xf32> to vector<16xf32>
      %20 = vector.shape_cast %19 : vector<16xf32> to vector<16x1xf32>
      %cst_17 = arith.constant 3.200000e+01 : f32
      %21 = vector.broadcast %cst_17 : f32 to vector<16x1xf32>
      %22 = arith.divf %20, %21 : vector<16x1xf32>
      %23 = vector.broadcast %22 : vector<16x1xf32> to vector<16x32xf32>
      %24 = arith.subf %18, %23 : vector<16x32xf32>
      %25 = arith.mulf %24, %24 : vector<16x32xf32>
      %cst_18 = arith.constant dense<0.000000e+00> : vector<16xf32>
      %26 = vector.multi_reduction <add>, %25, %cst_18 [1] : vector<16x32xf32> to vector<16xf32>
      %27 = vector.shape_cast %26 : vector<16xf32> to vector<16x1xf32>
      %cst_19 = arith.constant 3.200000e+01 : f32
      %28 = vector.broadcast %cst_19 : f32 to vector<16x1xf32>
      %29 = arith.divf %27, %28 : vector<16x1xf32>
      %30 = vector.broadcast %22 : vector<16x1xf32> to vector<16x32xf32>
      %31 = arith.subf %18, %30 : vector<16x32xf32>
      %cst_20 = arith.constant 9.99999996E-13 : f32
      %32 = vector.broadcast %cst_20 : f32 to vector<16x1xf32>
      %33 = arith.addf %29, %32 : vector<16x1xf32>
      %34 = math.rsqrt %33 : vector<16x1xf32>
      %35 = vector.broadcast %34 : vector<16x1xf32> to vector<16x32xf32>
      %36 = arith.mulf %31, %35 : vector<16x32xf32>
      %c0_21 = arith.constant 0 : index
      %c0_22 = arith.constant 0 : index
      %37 = vector.load %arg6[%c0_21, %c0_22] : memref<1x32xf32, #tpu.memory_space<vmem>>, vector<1x32xf32>
      %38 = vector.broadcast %37 : vector<1x32xf32> to vector<16x32xf32>
      %39 = arith.mulf %36, %38 : vector<16x32xf32>
      %c0_23 = arith.constant 0 : index
      %c0_24 = arith.constant 0 : index
      %40 = vector.load %arg7[%c0_23, %c0_24] : memref<1x32xf32, #tpu.memory_space<vmem>>, vector<1x32xf32>
      %41 = vector.broadcast %40 : vector<1x32xf32> to vector<16x32xf32>
      %42 = arith.addf %39, %41 : vector<16x32xf32>
      %43 = arith.truncf %42 : vector<16x32xf32> to vector<16x32xbf16>
      %c0_25 = arith.constant 0 : index
      %c0_26 = arith.constant 0 : index
      %44 = vector.load %arg8[%c0_25, %c0_26] : memref<16x32xbf16, #tpu.memory_space<vmem>>, vector<16x32xbf16>
      tpu.vector_store %arg8[%c0_25, %c0_26], %43 {strides = array<i32>} : memref<16x32xbf16, #tpu.memory_space<vmem>>, vector<16x32xbf16>,
    } else {
    }
    return
  }
  func.func @transform_0(%arg0: i32, %arg1: i32) -> (i32, i32) {
    %c0_i32 = arith.constant 0 : i32
    return %arg0, %arg1 : i32, i32
  }
  func.func @transform_1(%arg0: i32, %arg1: i32) -> (i32, i32) {
    %c0_i32 = arith.constant 0 : i32
    %c0_i32_0 = arith.constant 0 : i32
    return %arg1, %c0_i32 : i32, i32
  }
  func.func @transform_2(%arg0: i32, %arg1: i32) -> (i32, i32) {
    %c0_i32 = arith.constant 0 : i32
    %c0_i32_0 = arith.constant 0 : i32
    %c0_i32_1 = arith.constant 0 : i32
    return %c0_i32, %c0_i32_0 : i32, i32
  }
  func.func @transform_3(%arg0: i32, %arg1: i32) -> (i32, i32) {
    %c0_i32 = arith.constant 0 : i32
    %c0_i32_0 = arith.constant 0 : i32
    return %arg0, %c0_i32 : i32, i32
  }
  func.func @transform_4(%arg0: i32, %arg1: i32) -> (i32, i32) {
    %c0_i32 = arith.constant 0 : i32
    %c0_i32_0 = arith.constant 0 : i32
    %c0_i32_1 = arith.constant 0 : i32
    return %c0_i32, %c0_i32_0 : i32, i32
  }
  func.func @transform_5(%arg0: i32, %arg1: i32) -> (i32, i32) {
    %c0_i32 = arith.constant 0 : i32
    %c0_i32_0 = arith.constant 0 : i32
    %c0_i32_1 = arith.constant 0 : i32
    return %c0_i32, %c0_i32_0 : i32, i32
  }
  func.func @transform_6(%arg0: i32, %arg1: i32) -> (i32, i32) {
    %c0_i32 = arith.constant 0 : i32
    %c0_i32_0 = arith.constant 0 : i32
    return %arg0, %c0_i32 : i32, i32
  }
}

module attributes {stable_mosaic.version = 11 : i64} {
  func.func @_dense_kernel(%arg0: i32, %arg1: i32, %arg2: i32, %arg3: memref<16x32xbf16, #tpu.memory_space<vmem>>, %arg4: memref<32x64xbf16, #tpu.memory_space<vmem>>, %arg5: memref<1x64xf32, #tpu.memory_space<vmem>>, %arg6: memref<16x64xbf16, #tpu.memory_space<vmem>>, %arg7: memref<16x64xf32, #tpu.memory_space<vmem>>) attributes {dimension_semantics = [#tpu.dimension_semantics<parallel>, #tpu.dimension_semantics<parallel>, #tpu.dimension_semantics<arbitrary>], iteration_bounds = array<i64: 1, 1, 1>, scalar_prefetch = 0 : i64, scratch_operands = 1 : i64, tpu.core_type = #tpu.core_type<tc>, window_params = [{transform_indices = @transform_0, window_bounds = array<i64: 16, 32>}, {transform_indices = @transform_1, window_bounds = array<i64: 32, 64>}, {transform_indices = @transform_2, window_bounds = array<i64: 1, 64>}, {transform_indices = @transform_3, window_bounds = array<i64: 16, 64>}]} {
    %c0_i32 = arith.constant 0 : i32
    %0 = arith.cmpi eq, %arg2, %c0_i32 : i32
    %1 = arith.extui %0 : i1 to i32
    %c0_i32_0 = arith.constant 0 : i32
    %2 = arith.cmpi ne, %1, %c0_i32_0 : i32
    scf.if %2 {
      %cst_10 = arith.constant 0.000000e+00 : f32
      %12 = vector.broadcast %cst_10 : f32 to vector<16x64xf32>
      %c0_11 = arith.constant 0 : index
      %c0_12 = arith.constant 0 : index
      %13 = vector.load %arg7[%c0_11, %c0_12] : memref<16x64xf32, #tpu.memory_space<vmem>>, vector<16x64xf32>
      tpu.vector_store %arg7[%c0_11, %c0_12], %12 {strides = array<i32>} : memref<16x64xf32, #tpu.memory_space<vmem>>, vector<16x64xf32>,
    } else {
    }
    %c0 = arith.constant 0 : index
    %c0_1 = arith.constant 0 : index
    %3 = vector.load %arg7[%c0, %c0_1] : memref<16x64xf32, #tpu.memory_space<vmem>>, vector<16x64xf32>
    %c0_2 = arith.constant 0 : index
    %c0_3 = arith.constant 0 : index
    %4 = vector.load %arg3[%c0_2, %c0_3] : memref<16x32xbf16, #tpu.memory_space<vmem>>, vector<16x32xbf16>
    %c0_4 = arith.constant 0 : index
    %c0_5 = arith.constant 0 : index
    %5 = vector.load %arg4[%c0_4, %c0_5] : memref<32x64xbf16, #tpu.memory_space<vmem>>, vector<32x64xbf16>
    %cst = arith.constant dense<0.000000e+00> : vector<16x64xf32>
    %6 = tpu.matmul %4, %5, %cst {dimension_numbers = #tpu.dot_dimension_numbers<[1], [0], [0], [1], [0, 0, 1, 1], [], []>} : vector<16x32xbf16>, vector<32x64xbf16>, vector<16x64xf32> -> vector<16x64xf32>
    %7 = arith.addf %3, %6 : vector<16x64xf32>
    %c0_6 = arith.constant 0 : index
    %c0_7 = arith.constant 0 : index
    %8 = vector.load %arg7[%c0_6, %c0_7] : memref<16x64xf32, #tpu.memory_space<vmem>>, vector<16x64xf32>
    tpu.vector_store %arg7[%c0_6, %c0_7], %7 {strides = array<i32>} : memref<16x64xf32, #tpu.memory_space<vmem>>, vector<16x64xf32>,
    %c0_i32_8 = arith.constant 0 : i32
    %9 = arith.cmpi eq, %arg2, %c0_i32_8 : i32
    %10 = arith.extui %9 : i1 to i32
    %c0_i32_9 = arith.constant 0 : i32
    %11 = arith.cmpi ne, %10, %c0_i32_9 : i32
    scf.if %11 {
      %c0_10 = arith.constant 0 : index
      %c0_11 = arith.constant 0 : index
      %12 = vector.load %arg7[%c0_10, %c0_11] : memref<16x64xf32, #tpu.memory_space<vmem>>, vector<16x64xf32>
      %c0_12 = arith.constant 0 : index
      %c0_13 = arith.constant 0 : index
      %13 = vector.load %arg5[%c0_12, %c0_13] : memref<1x64xf32, #tpu.memory_space<vmem>>, vector<1x64xf32>
      %14 = vector.broadcast %13 : vector<1x64xf32> to vector<16x64xf32>
      %15 = arith.addf %12, %14 : vector<16x64xf32>
      %cst_14 = arith.constant 5.000000e-01 : f32
      %16 = vector.broadcast %cst_14 : f32 to vector<16x64xf32>
      %17 = arith.mulf %16, %15 : vector<16x64xf32>
      %cst_15 = arith.constant 4.471500e-02 : f32
      %18 = vector.broadcast %cst_15 : f32 to vector<16x64xf32>
      %19 = arith.mulf %18, %15 : vector<16x64xf32>
      %20 = arith.mulf %19, %15 : vector<16x64xf32>
      %21 = arith.mulf %20, %15 : vector<16x64xf32>
      %22 = arith.addf %15, %21 : vector<16x64xf32>
      %cst_16 = arith.constant 0.797884583 : f32
      %23 = vector.broadcast %cst_16 : f32 to vector<16x64xf32>
      %24 = arith.mulf %23, %22 : vector<16x64xf32>
      %25 = math.tanh %24 : vector<16x64xf32>
      %cst_17 = arith.constant 1.000000e+00 : f32
      %26 = vector.broadcast %cst_17 : f32 to vector<16x64xf32>
      %27 = arith.addf %26, %25 : vector<16x64xf32>
      %28 = arith.mulf %17, %27 : vector<16x64xf32>
      %29 = arith.truncf %28 : vector<16x64xf32> to vector<16x64xbf16>
      %c0_18 = arith.constant 0 : index
      %c0_19 = arith.constant 0 : index
      %30 = vector.load %arg6[%c0_18, %c0_19] : memref<16x64xbf16, #tpu.memory_space<vmem>>, vector<16x64xbf16>
      tpu.vector_store %arg6[%c0_18, %c0_19], %29 {strides = array<i32>} : memref<16x64xbf16, #tpu.memory_space<vmem>>, vector<16x64xbf16>,
    } else {
    }
    return
  }
  func.func @transform_0(%arg0: i32, %arg1: i32, %arg2: i32) -> (i32, i32) {
    %c0_i32 = arith.constant 0 : i32
    return %arg0, %arg2 : i32, i32
  }
  func.func @transform_1(%arg0: i32, %arg1: i32, %arg2: i32) -> (i32, i32) {
    %c0_i32 = arith.constant 0 : i32
    return %arg2, %arg1 : i32, i32
  }
  func.func @transform_2(%arg0: i32, %arg1: i32, %arg2: i32) -> (i32, i32) {
    %c0_i32 = arith.constant 0 : i32
    %c0_i32_0 = arith.constant 0 : i32
    return %c0_i32, %arg1 : i32, i32
  }
  func.func @transform_3(%arg0: i32, %arg1: i32, %arg2: i32) -> (i32, i32) {
    %c0_i32 = arith.constant 0 : i32
    return %arg0, %arg1 : i32, i32
  }
}

module attributes {stable_mosaic.version = 11 : i64} {
  func.func @_dense_res_ln_kernel(%arg0: i32, %arg1: i32, %arg2: memref<16x64xbf16, #tpu.memory_space<vmem>>, %arg3: memref<64x32xbf16, #tpu.memory_space<vmem>>, %arg4: memref<1x32xf32, #tpu.memory_space<vmem>>, %arg5: memref<16x32xbf16, #tpu.memory_space<vmem>>, %arg6: memref<1x32xf32, #tpu.memory_space<vmem>>, %arg7: memref<1x32xf32, #tpu.memory_space<vmem>>, %arg8: memref<16x32xbf16, #tpu.memory_space<vmem>>, %arg9: memref<16x32xf32, #tpu.memory_space<vmem>>) attributes {dimension_semantics = [#tpu.dimension_semantics<parallel>, #tpu.dimension_semantics<arbitrary>], iteration_bounds = array<i64: 1, 1>, scalar_prefetch = 0 : i64, scratch_operands = 1 : i64, tpu.core_type = #tpu.core_type<tc>, window_params = [{transform_indices = @transform_0, window_bounds = array<i64: 16, 64>}, {transform_indices = @transform_1, window_bounds = array<i64: 64, 32>}, {pipeline_mode = #tpu.pipeline_mode<synchronous>, transform_indices = @transform_2, window_bounds = array<i64: 1, 32>}, {transform_indices = @transform_3, window_bounds = array<i64: 16, 32>}, {pipeline_mode = #tpu.pipeline_mode<synchronous>, transform_indices = @transform_4, window_bounds = array<i64: 1, 32>}, {pipeline_mode = #tpu.pipeline_mode<synchronous>, transform_indices = @transform_5, window_bounds = array<i64: 1, 32>}, {transform_indices = @transform_6, window_bounds = array<i64: 16, 32>}]} {
    %c0_i32 = arith.constant 0 : i32
    %0 = arith.cmpi eq, %arg1, %c0_i32 : i32
    %1 = arith.extui %0 : i1 to i32
    %c0_i32_0 = arith.constant 0 : i32
    %2 = arith.cmpi ne, %1, %c0_i32_0 : i32
    scf.if %2 {
      %cst_10 = arith.constant 0.000000e+00 : f32
      %12 = vector.broadcast %cst_10 : f32 to vector<16x32xf32>
      %c0_11 = arith.constant 0 : index
      %c0_12 = arith.constant 0 : index
      %13 = vector.load %arg9[%c0_11, %c0_12] : memref<16x32xf32, #tpu.memory_space<vmem>>, vector<16x32xf32>
      tpu.vector_store %arg9[%c0_11, %c0_12], %12 {strides = array<i32>} : memref<16x32xf32, #tpu.memory_space<vmem>>, vector<16x32xf32>,
    } else {
    }
    %c0 = arith.constant 0 : index
    %c0_1 = arith.constant 0 : index
    %3 = vector.load %arg9[%c0, %c0_1] : memref<16x32xf32, #tpu.memory_space<vmem>>, vector<16x32xf32>
    %c0_2 = arith.constant 0 : index
    %c0_3 = arith.constant 0 : index
    %4 = vector.load %arg2[%c0_2, %c0_3] : memref<16x64xbf16, #tpu.memory_space<vmem>>, vector<16x64xbf16>
    %c0_4 = arith.constant 0 : index
    %c0_5 = arith.constant 0 : index
    %5 = vector.load %arg3[%c0_4, %c0_5] : memref<64x32xbf16, #tpu.memory_space<vmem>>, vector<64x32xbf16>
    %cst = arith.constant dense<0.000000e+00> : vector<16x32xf32>
    %6 = tpu.matmul %4, %5, %cst {dimension_numbers = #tpu.dot_dimension_numbers<[1], [0], [0], [1], [0, 0, 1, 1], [], []>} : vector<16x64xbf16>, vector<64x32xbf16>, vector<16x32xf32> -> vector<16x32xf32>
    %7 = arith.addf %3, %6 : vector<16x32xf32>
    %c0_6 = arith.constant 0 : index
    %c0_7 = arith.constant 0 : index
    %8 = vector.load %arg9[%c0_6, %c0_7] : memref<16x32xf32, #tpu.memory_space<vmem>>, vector<16x32xf32>
    tpu.vector_store %arg9[%c0_6, %c0_7], %7 {strides = array<i32>} : memref<16x32xf32, #tpu.memory_space<vmem>>, vector<16x32xf32>,
    %c0_i32_8 = arith.constant 0 : i32
    %9 = arith.cmpi eq, %arg1, %c0_i32_8 : i32
    %10 = arith.extui %9 : i1 to i32
    %c0_i32_9 = arith.constant 0 : i32
    %11 = arith.cmpi ne, %10, %c0_i32_9 : i32
    scf.if %11 {
      %c0_10 = arith.constant 0 : index
      %c0_11 = arith.constant 0 : index
      %12 = vector.load %arg9[%c0_10, %c0_11] : memref<16x32xf32, #tpu.memory_space<vmem>>, vector<16x32xf32>
      %c0_12 = arith.constant 0 : index
      %c0_13 = arith.constant 0 : index
      %13 = vector.load %arg4[%c0_12, %c0_13] : memref<1x32xf32, #tpu.memory_space<vmem>>, vector<1x32xf32>
      %14 = vector.broadcast %13 : vector<1x32xf32> to vector<16x32xf32>
      %15 = arith.addf %12, %14 : vector<16x32xf32>
      %c0_14 = arith.constant 0 : index
      %c0_15 = arith.constant 0 : index
      %16 = vector.load %arg5[%c0_14, %c0_15] : memref<16x32xbf16, #tpu.memory_space<vmem>>, vector<16x32xbf16>
      %17 = arith.extf %16 : vector<16x32xbf16> to vector<16x32xf32>
      %18 = arith.addf %15, %17 : vector<16x32xf32>
      %cst_16 = arith.constant dense<0.000000e+00> : vector<16xf32>
      %19 = vector.multi_reduction <add>, %18, %cst_16 [1] : vector<16x32xf32> to vector<16xf32>
      %20 = vector.shape_cast %19 : vector<16xf32> to vector<16x1xf32>
      %cst_17 = arith.constant 3.200000e+01 : f32
      %21 = vector.broadcast %cst_17 : f32 to vector<16x1xf32>
      %22 = arith.divf %20, %21 : vector<16x1xf32>
      %23 = vector.broadcast %22 : vector<16x1xf32> to vector<16x32xf32>
      %24 = arith.subf %18, %23 : vector<16x32xf32>
      %25 = arith.mulf %24, %24 : vector<16x32xf32>
      %cst_18 = arith.constant dense<0.000000e+00> : vector<16xf32>
      %26 = vector.multi_reduction <add>, %25, %cst_18 [1] : vector<16x32xf32> to vector<16xf32>
      %27 = vector.shape_cast %26 : vector<16xf32> to vector<16x1xf32>
      %cst_19 = arith.constant 3.200000e+01 : f32
      %28 = vector.broadcast %cst_19 : f32 to vector<16x1xf32>
      %29 = arith.divf %27, %28 : vector<16x1xf32>
      %30 = vector.broadcast %22 : vector<16x1xf32> to vector<16x32xf32>
      %31 = arith.subf %18, %30 : vector<16x32xf32>
      %cst_20 = arith.constant 9.99999996E-13 : f32
      %32 = vector.broadcast %cst_20 : f32 to vector<16x1xf32>
      %33 = arith.addf %29, %32 : vector<16x1xf32>
      %34 = math.rsqrt %33 : vector<16x1xf32>
      %35 = vector.broadcast %34 : vector<16x1xf32> to vector<16x32xf32>
      %36 = arith.mulf %31, %35 : vector<16x32xf32>
      %c0_21 = arith.constant 0 : index
      %c0_22 = arith.constant 0 : index
      %37 = vector.load %arg6[%c0_21, %c0_22] : memref<1x32xf32, #tpu.memory_space<vmem>>, vector<1x32xf32>
      %38 = vector.broadcast %37 : vector<1x32xf32> to vector<16x32xf32>
      %39 = arith.mulf %36, %38 : vector<16x32xf32>
      %c0_23 = arith.constant 0 : index
      %c0_24 = arith.constant 0 : index
      %40 = vector.load %arg7[%c0_23, %c0_24] : memref<1x32xf32, #tpu.memory_space<vmem>>, vector<1x32xf32>
      %41 = vector.broadcast %40 : vector<1x32xf32> to vector<16x32xf32>
      %42 = arith.addf %39, %41 : vector<16x32xf32>
      %43 = arith.truncf %42 : vector<16x32xf32> to vector<16x32xbf16>
      %c0_25 = arith.constant 0 : index
      %c0_26 = arith.constant 0 : index
      %44 = vector.load %arg8[%c0_25, %c0_26] : memref<16x32xbf16, #tpu.memory_space<vmem>>, vector<16x32xbf16>
      tpu.vector_store %arg8[%c0_25, %c0_26], %43 {strides = array<i32>} : memref<16x32xbf16, #tpu.memory_space<vmem>>, vector<16x32xbf16>,
    } else {
    }
    return
  }
  func.func @transform_0(%arg0: i32, %arg1: i32) -> (i32, i32) {
    %c0_i32 = arith.constant 0 : i32
    return %arg0, %arg1 : i32, i32
  }
  func.func @transform_1(%arg0: i32, %arg1: i32) -> (i32, i32) {
    %c0_i32 = arith.constant 0 : i32
    %c0_i32_0 = arith.constant 0 : i32
    return %arg1, %c0_i32 : i32, i32
  }
  func.func @transform_2(%arg0: i32, %arg1: i32) -> (i32, i32) {
    %c0_i32 = arith.constant 0 : i32
    %c0_i32_0 = arith.constant 0 : i32
    %c0_i32_1 = arith.constant 0 : i32
    return %c0_i32, %c0_i32_0 : i32, i32
  }
  func.func @transform_3(%arg0: i32, %arg1: i32) -> (i32, i32) {
    %c0_i32 = arith.constant 0 : i32
    %c0_i32_0 = arith.constant 0 : i32
    return %arg0, %c0_i32 : i32, i32
  }
  func.func @transform_4(%arg0: i32, %arg1: i32) -> (i32, i32) {
    %c0_i32 = arith.constant 0 : i32
    %c0_i32_0 = arith.constant 0 : i32
    %c0_i32_1 = arith.constant 0 : i32
    return %c0_i32, %c0_i32_0 : i32, i32
  }
  func.func @transform_5(%arg0: i32, %arg1: i32) -> (i32, i32) {
    %c0_i32 = arith.constant 0 : i32
    %c0_i32_0 = arith.constant 0 : i32
    %c0_i32_1 = arith.constant 0 : i32
    return %c0_i32, %c0_i32_0 : i32, i32
  }
  func.func @transform_6(%arg0: i32, %arg1: i32) -> (i32, i32) {
    %c0_i32 = arith.constant 0 : i32
    %c0_i32_0 = arith.constant 0 : i32
    return %arg0, %c0_i32 : i32, i32
  }
}

module attributes {stable_mosaic.version = 11 : i64} {
  func.func @_dense_kernel(%arg0: i32, %arg1: i32, %arg2: i32, %arg3: memref<16x32xbf16, #tpu.memory_space<vmem>>, %arg4: memref<32x128xbf16, #tpu.memory_space<vmem>>, %arg5: memref<1x128xf32, #tpu.memory_space<vmem>>, %arg6: memref<16x128xf32, #tpu.memory_space<vmem>>, %arg7: memref<16x128xf32, #tpu.memory_space<vmem>>) attributes {dimension_semantics = [#tpu.dimension_semantics<parallel>, #tpu.dimension_semantics<parallel>, #tpu.dimension_semantics<arbitrary>], iteration_bounds = array<i64: 1, 1, 1>, scalar_prefetch = 0 : i64, scratch_operands = 1 : i64, tpu.core_type = #tpu.core_type<tc>, window_params = [{transform_indices = @transform_0, window_bounds = array<i64: 16, 32>}, {transform_indices = @transform_1, window_bounds = array<i64: 32, 128>}, {transform_indices = @transform_2, window_bounds = array<i64: 1, 128>}, {transform_indices = @transform_3, window_bounds = array<i64: 16, 128>}]} {
    %c0_i32 = arith.constant 0 : i32
    %0 = arith.cmpi eq, %arg2, %c0_i32 : i32
    %1 = arith.extui %0 : i1 to i32
    %c0_i32_0 = arith.constant 0 : i32
    %2 = arith.cmpi ne, %1, %c0_i32_0 : i32
    scf.if %2 {
      %cst_10 = arith.constant 0.000000e+00 : f32
      %12 = vector.broadcast %cst_10 : f32 to vector<16x128xf32>
      %c0_11 = arith.constant 0 : index
      %c0_12 = arith.constant 0 : index
      %13 = vector.load %arg7[%c0_11, %c0_12] : memref<16x128xf32, #tpu.memory_space<vmem>>, vector<16x128xf32>
      tpu.vector_store %arg7[%c0_11, %c0_12], %12 {strides = array<i32>} : memref<16x128xf32, #tpu.memory_space<vmem>>, vector<16x128xf32>,
    } else {
    }
    %c0 = arith.constant 0 : index
    %c0_1 = arith.constant 0 : index
    %3 = vector.load %arg7[%c0, %c0_1] : memref<16x128xf32, #tpu.memory_space<vmem>>, vector<16x128xf32>
    %c0_2 = arith.constant 0 : index
    %c0_3 = arith.constant 0 : index
    %4 = vector.load %arg3[%c0_2, %c0_3] : memref<16x32xbf16, #tpu.memory_space<vmem>>, vector<16x32xbf16>
    %c0_4 = arith.constant 0 : index
    %c0_5 = arith.constant 0 : index
    %5 = vector.load %arg4[%c0_4, %c0_5] : memref<32x128xbf16, #tpu.memory_space<vmem>>, vector<32x128xbf16>
    %cst = arith.constant dense<0.000000e+00> : vector<16x128xf32>
    %6 = tpu.matmul %4, %5, %cst {dimension_numbers = #tpu.dot_dimension_numbers<[1], [0], [0], [1], [0, 0, 1, 1], [], []>} : vector<16x32xbf16>, vector<32x128xbf16>, vector<16x128xf32> -> vector<16x128xf32>
    %7 = arith.addf %3, %6 : vector<16x128xf32>
    %c0_6 = arith.constant 0 : index
    %c0_7 = arith.constant 0 : index
    %8 = vector.load %arg7[%c0_6, %c0_7] : memref<16x128xf32, #tpu.memory_space<vmem>>, vector<16x128xf32>
    tpu.vector_store %arg7[%c0_6, %c0_7], %7 {strides = array<i32>} : memref<16x128xf32, #tpu.memory_space<vmem>>, vector<16x128xf32>,
    %c0_i32_8 = arith.constant 0 : i32
    %9 = arith.cmpi eq, %arg2, %c0_i32_8 : i32
    %10 = arith.extui %9 : i1 to i32
    %c0_i32_9 = arith.constant 0 : i32
    %11 = arith.cmpi ne, %10, %c0_i32_9 : i32
    scf.if %11 {
      %c0_10 = arith.constant 0 : index
      %c0_11 = arith.constant 0 : index
      %12 = vector.load %arg7[%c0_10, %c0_11] : memref<16x128xf32, #tpu.memory_space<vmem>>, vector<16x128xf32>
      %c0_12 = arith.constant 0 : index
      %c0_13 = arith.constant 0 : index
      %13 = vector.load %arg5[%c0_12, %c0_13] : memref<1x128xf32, #tpu.memory_space<vmem>>, vector<1x128xf32>
      %14 = vector.broadcast %13 : vector<1x128xf32> to vector<16x128xf32>
      %15 = arith.addf %12, %14 : vector<16x128xf32>
      %c0_14 = arith.constant 0 : index
      %c0_15 = arith.constant 0 : index
      %16 = vector.load %arg6[%c0_14, %c0_15] : memref<16x128xf32, #tpu.memory_space<vmem>>, vector<16x128xf32>
      tpu.vector_store %arg6[%c0_14, %c0_15], %15 {strides = array<i32>} : memref<16x128xf32, #tpu.memory_space<vmem>>, vector<16x128xf32>,
    } else {
    }
    return
  }
  func.func @transform_0(%arg0: i32, %arg1: i32, %arg2: i32) -> (i32, i32) {
    %c0_i32 = arith.constant 0 : i32
    return %arg0, %arg2 : i32, i32
  }
  func.func @transform_1(%arg0: i32, %arg1: i32, %arg2: i32) -> (i32, i32) {
    %c0_i32 = arith.constant 0 : i32
    return %arg2, %arg1 : i32, i32
  }
  func.func @transform_2(%arg0: i32, %arg1: i32, %arg2: i32) -> (i32, i32) {
    %c0_i32 = arith.constant 0 : i32
    %c0_i32_0 = arith.constant 0 : i32
    return %c0_i32, %arg1 : i32, i32
  }
  func.func @transform_3(%arg0: i32, %arg1: i32, %arg2: i32) -> (i32, i32) {
    %c0_i32 = arith.constant 0 : i32
    return %arg0, %arg1 : i32, i32
  }
}

module attributes {stable_mosaic.version = 11 : i64} {
  func.func @_ce_loss_kernel(%arg0: i32, %arg1: memref<16x128xf32, #tpu.memory_space<vmem>>, %arg2: memref<16x1xi32, #tpu.memory_space<vmem>>, %arg3: memref<1x1xf32, #tpu.memory_space<vmem>>, %arg4: memref<1x1xf32, #tpu.memory_space<vmem>>, %arg5: memref<1x1xf32, #tpu.memory_space<vmem>>) attributes {dimension_semantics = [#tpu.dimension_semantics<arbitrary>], iteration_bounds = array<i64: 1>, scalar_prefetch = 0 : i64, scratch_operands = 2 : i64, tpu.core_type = #tpu.core_type<tc>, window_params = [{transform_indices = @transform_0, window_bounds = array<i64: 16, 128>}, {transform_indices = @transform_1, window_bounds = array<i64: 16, 1>}, {pipeline_mode = #tpu.pipeline_mode<synchronous>, transform_indices = @transform_2, window_bounds = array<i64: 1, 1>}]} {
    %c0_i32 = arith.constant 0 : i32
    %0 = arith.cmpi eq, %arg0, %c0_i32 : i32
    %1 = arith.extui %0 : i1 to i32
    %c0_i32_0 = arith.constant 0 : i32
    %2 = arith.cmpi ne, %1, %c0_i32_0 : i32
    scf.if %2 {
      %cst_19 = arith.constant 0.000000e+00 : f32
      %46 = vector.broadcast %cst_19 : f32 to vector<1x1xf32>
      %c0_20 = arith.constant 0 : index
      %c0_21 = arith.constant 0 : index
      %47 = vector.load %arg4[%c0_20, %c0_21] : memref<1x1xf32, #tpu.memory_space<vmem>>, vector<1x1xf32>
      tpu.vector_store %arg4[%c0_20, %c0_21], %46 {strides = array<i32>} : memref<1x1xf32, #tpu.memory_space<vmem>>, vector<1x1xf32>,
      %cst_22 = arith.constant 0.000000e+00 : f32
      %48 = vector.broadcast %cst_22 : f32 to vector<1x1xf32>
      %c0_23 = arith.constant 0 : index
      %c0_24 = arith.constant 0 : index
      %49 = vector.load %arg5[%c0_23, %c0_24] : memref<1x1xf32, #tpu.memory_space<vmem>>, vector<1x1xf32>
      tpu.vector_store %arg5[%c0_23, %c0_24], %48 {strides = array<i32>} : memref<1x1xf32, #tpu.memory_space<vmem>>, vector<1x1xf32>,
    } else {
    }
    %c0 = arith.constant 0 : index
    %c0_1 = arith.constant 0 : index
    %3 = vector.load %arg1[%c0, %c0_1] : memref<16x128xf32, #tpu.memory_space<vmem>>, vector<16x128xf32>
    %c0_2 = arith.constant 0 : index
    %c0_3 = arith.constant 0 : index
    %4 = vector.load %arg2[%c0_2, %c0_3] : memref<16x1xi32, #tpu.memory_space<vmem>>, vector<16x1xi32>
    %cst = arith.constant dense<0xFF800000> : vector<16xf32>
    %5 = vector.multi_reduction <maximumf>, %3, %cst [1] : vector<16x128xf32> to vector<16xf32>
    %6 = vector.shape_cast %5 : vector<16xf32> to vector<16x1xf32>
    %7 = vector.broadcast %6 : vector<16x1xf32> to vector<16x128xf32>
    %8 = arith.subf %3, %7 : vector<16x128xf32>
    %9 = math.exp %8 : vector<16x128xf32>
    %cst_4 = arith.constant dense<0.000000e+00> : vector<16xf32>
    %10 = vector.multi_reduction <add>, %9, %cst_4 [1] : vector<16x128xf32> to vector<16xf32>
    %11 = vector.shape_cast %10 : vector<16xf32> to vector<16x1xf32>
    %12 = math.log %11 : vector<16x1xf32>
    %13 = arith.addf %12, %6 : vector<16x1xf32>
    %14 = tpu.iota {dimensions = array<i32: 1>} : vector<16x128xi32>
    %15 = vector.broadcast %4 : vector<16x1xi32> to vector<16x128xi32>
    %16 = arith.cmpi eq, %14, %15 : vector<16x128xi32>
    %cst_5 = arith.constant 0.000000e+00 : f32
    %17 = vector.broadcast %cst_5 : f32 to vector<16x128xf32>
    %18 = arith.select %16, %3, %17 : vector<16x128xi1>, vector<16x128xf32>
    %cst_6 = arith.constant dense<0.000000e+00> : vector<16xf32>
    %19 = vector.multi_reduction <add>, %18, %cst_6 [1] : vector<16x128xf32> to vector<16xf32>
    %20 = vector.shape_cast %19 : vector<16xf32> to vector<16x1xf32>
    %c-100_i32 = arith.constant -100 : i32
    %21 = vector.broadcast %c-100_i32 : i32 to vector<16x1xi32>
    %22 = arith.cmpi ne, %4, %21 : vector<16x1xi32>
    %23 = arith.extui %22 : vector<16x1xi1> to vector<16x1xi32>
    %24 = arith.sitofp %23 : vector<16x1xi32> to vector<16x1xf32>
    %c0_7 = arith.constant 0 : index
    %c0_8 = arith.constant 0 : index
    %25 = vector.load %arg4[%c0_7, %c0_8] : memref<1x1xf32, #tpu.memory_space<vmem>>, vector<1x1xf32>
    %26 = arith.subf %13, %20 : vector<16x1xf32>
    %27 = arith.mulf %26, %24 : vector<16x1xf32>
    %28 = vector.shape_cast %27 : vector<16x1xf32> to vector<1x16x1xf32>
    %cst_9 = arith.constant dense<0.000000e+00> : vector<1xf32>
    %29 = vector.multi_reduction <add>, %28, %cst_9 [1, 2] : vector<1x16x1xf32> to vector<1xf32>
    %30 = vector.shape_cast %29 : vector<1xf32> to vector<1x1x1xf32>
    %31 = vector.extract %30[0, 0, 0] : f32 from vector<1x1x1xf32>
    %32 = vector.broadcast %31 : f32 to vector<1x1xf32>
    %33 = arith.addf %25, %32 : vector<1x1xf32>
    %c0_10 = arith.constant 0 : index
    %c0_11 = arith.constant 0 : index
    %34 = vector.load %arg4[%c0_10, %c0_11] : memref<1x1xf32, #tpu.memory_space<vmem>>, vector<1x1xf32>
    tpu.vector_store %arg4[%c0_10, %c0_11], %33 {strides = array<i32>} : memref<1x1xf32, #tpu.memory_space<vmem>>, vector<1x1xf32>,
    %c0_12 = arith.constant 0 : index
    %c0_13 = arith.constant 0 : index
    %35 = vector.load %arg5[%c0_12, %c0_13] : memref<1x1xf32, #tpu.memory_space<vmem>>, vector<1x1xf32>
    %36 = vector.shape_cast %24 : vector<16x1xf32> to vector<1x16x1xf32>
    %cst_14 = arith.constant dense<0.000000e+00> : vector<1xf32>
    %37 = vector.multi_reduction <add>, %36, %cst_14 [1, 2] : vector<1x16x1xf32> to vector<1xf32>
    %38 = vector.shape_cast %37 : vector<1xf32> to vector<1x1x1xf32>
    %39 = vector.extract %38[0, 0, 0] : f32 from vector<1x1x1xf32>
    %40 = vector.broadcast %39 : f32 to vector<1x1xf32>
    %41 = arith.addf %35, %40 : vector<1x1xf32>
    %c0_15 = arith.constant 0 : index
    %c0_16 = arith.constant 0 : index
    %42 = vector.load %arg5[%c0_15, %c0_16] : memref<1x1xf32, #tpu.memory_space<vmem>>, vector<1x1xf32>
    tpu.vector_store %arg5[%c0_15, %c0_16], %41 {strides = array<i32>} : memref<1x1xf32, #tpu.memory_space<vmem>>, vector<1x1xf32>,
    %c0_i32_17 = arith.constant 0 : i32
    %43 = arith.cmpi eq, %arg0, %c0_i32_17 : i32
    %44 = arith.extui %43 : i1 to i32
    %c0_i32_18 = arith.constant 0 : i32
    %45 = arith.cmpi ne, %44, %c0_i32_18 : i32
    scf.if %45 {
      %c0_19 = arith.constant 0 : index
      %c0_20 = arith.constant 0 : index
      %46 = vector.load %arg4[%c0_19, %c0_20] : memref<1x1xf32, #tpu.memory_space<vmem>>, vector<1x1xf32>
      %c0_21 = arith.constant 0 : index
      %c0_22 = arith.constant 0 : index
      %47 = vector.load %arg5[%c0_21, %c0_22] : memref<1x1xf32, #tpu.memory_space<vmem>>, vector<1x1xf32>
      %48 = arith.divf %46, %47 : vector<1x1xf32>
      %c0_23 = arith.constant 0 : index
      %c0_24 = arith.constant 0 : index
      %49 = vector.load %arg3[%c0_23, %c0_24] : memref<1x1xf32, #tpu.memory_space<vmem>>, vector<1x1xf32>
      tpu.vector_store %arg3[%c0_23, %c0_24], %48 {strides = array<i32>} : memref<1x1xf32, #tpu.memory_space<vmem>>, vector<1x1xf32>,
    } else {
    }
    return
  }
  func.func @transform_0(%arg0: i32) -> (i32, i32) {
    %c0_i32 = arith.constant 0 : i32
    %c0_i32_0 = arith.constant 0 : i32
    return %arg0, %c0_i32 : i32, i32
  }
  func.func @transform_1(%arg0: i32) -> (i32, i32) {
    %c0_i32 = arith.constant 0 : i32
    %c0_i32_0 = arith.constant 0 : i32
    return %arg0, %c0_i32 : i32, i32
  }
  func.func @transform_2(%arg0: i32) -> (i32, i32) {
    %c0_i32 = arith.constant 0 : i32
    %c0_i32_0 = arith.constant 0 : i32
    %c0_i32_1 = arith.constant 0 : i32
    return %c0_i32, %c0_i32_0 : i32, i32
  }
}

</mosaic_0001>

<bundles_post_ra>
// kernel: bert_token_classification_forward.13
= control target key start
LH: loop header
LB: loop body
LE: loop exit
PB: predicated region body
PF: predicated region fallthrough
CT: control target
= control target key end

     0   :  { %vm16_vm0 = vcmask 261120   ;;  %vm70_vm1 = vcmask 257024   ;;  %s129_s0 = inlined_call_operand.vmem [shape: f32[16,32], index: 0, kind: input, shape index: {}]   ;;  %s130_s1 = inlined_call_operand.vmem [shape: f32[1,32], index: 1, kind: input, shape index: {}]   ;;  %s131_s2 = inlined_call_operand.vmem [shape: f32[1,32], index: 2, kind: input, shape index: {}]   ;;  %s132_s3 = inlined_call_operand.vmem [shape: bf16[16,32], index: 3, kind: output, shape index: {}]  }
   0x1   :  { %v14_v0 = vld [vmem:[%s129_s0] sm:$0xff]  ;;  %v15_v1 = vld [vmem:[%s129_s0 + $0x8] sm:$0xff] }
   0x2   :  { %v17_v2 = vsel %vm16_vm0, %v14_v0, 0.0  ;;  %v20_v3 = vsel %vm16_vm0, %v15_v1, 0.0  ;;  %v77_v21 = vld [vmem:[%s130_s1] ss:$0 sm:$0xff] }
   0x3   :  { %18 = vadd.xlane.f32.xlu0 %v17_v2  ;;  %v78_v23 = vld [vmem:[%s131_s2] ss:$0 sm:$0xff] }
   0x7   :  { %21 = vadd.xlane.f32.xlu0 %v20_v3 }
  0x90   :  { %v19_v4 = vpop.xlane.xlu0 %18 }
  0x91   :  { %v24_v5 = vmul.f32 0.03125, %v19_v4 }
  0x93   :  { %v26_v6 = vsub.f32 %v14_v0, %v24_v5 }
  0x94   :  { %v22_v7 = vpop.xlane.xlu0 %21 }
  0x95   :  { %v25_v8 = vmul.f32 0.03125, %v22_v7  ;;  %v28_v9 = vmul.f32 %v26_v6, %v26_v6 }
  0x97   :  { %v27_v10 = vsub.f32 %v15_v1, %v25_v8  ;;  %v30_v11 = vsel %vm16_vm0, %v28_v9, 0.0 }
  0x98   :  { %31 = vadd.xlane.f32.xlu1 %v30_v11 }
  0x99   :  { %v29_v12 = vmul.f32 %v27_v10, %v27_v10 }
  0x9b   :  { %v33_v13 = vsel %vm16_vm0, %v29_v12, 0.0 }
  0x9c   :  { %34 = vadd.xlane.f32.xlu1 %v33_v13 }
 0x125   :  { %v32_v14 = vpop.xlane.xlu1 %31 }
 0x126   :  { %v36_v15 = vmul.f32 0.03125, %v32_v14 }
 0x128   :  { %v38_v16 = vadd.f32 1e-12, %v36_v15 }
 0x129   :  { %v35_v17 = vpop.xlane.xlu1 %34 }
 0x12a   :  { %83 = vrsqrt.f32 %v38_v16  ;;  %v37_v18 = vmul.f32 0.03125, %v35_v17 }
 0x12c   :  { %v39_v19 = vadd.f32 1e-12, %v37_v18 }
 0x12e   :  { %85 = vrsqrt.f32 %v39_v19 }
 0x134   :  { %v84_v20 = vpop.eup %83 }
 0x135   :  { %v42_v22 = vmul.f32 %v84_v20, %v26_v6 }
 0x137   :  { %v51_v24 = vmul.f32 %v77_v21, %v42_v22 }
 0x138   :  { %v86_v25 = vpop.eup %85 }
 0x139   :  { %v60_v26 = vadd.f32 %v78_v23, %v51_v24  ;;  %v43_v27 = vmul.f32 %v86_v25, %v27_v10 }
 0x13b   :  { %v81_v28 = vpack.c.bf16 %v60_v26, %v60_v26  ;;  %v52_v29 = vmul.f32 %v77_v21, %v43_v27 }
 0x13d   :  { %71 = vst.msk [vmem:[%s132_s3] sm:$0xf] %vm70_vm1, %v81_v28  ;;  %v61_v30 = vadd.f32 %v78_v23, %v52_v29 }
 0x13f   :  { %v82_v31 = vpack.c.bf16 %v61_v30, %v61_v30 }
 0x141   :  { %72 = vst.msk [vmem:[%s132_s3 + $0x4] sm:$0xf] %vm70_vm1, %v82_v31 }

// kernel: bert_token_classification_forward.14
= control target key start
LH: loop header
LB: loop body
LE: loop exit
PB: predicated region body
PF: predicated region fallthrough
CT: control target
= control target key end

     0   :  { %vm19_vm0 = vcmask 785408   ;;  %v175_v0 = vmov 0.0   ;;  %vm176_vm1 = vmmov 0   ;;  %vm47_vm2 = vcmask 261120   ;;  %s178_s21 = smov 96   ;;  %s239_s1 = inlined_call_operand.vmem [shape: bf16[32,96], index: 1, kind: input, shape index: {}]   ;;  %s240_s0 = inlined_call_operand.vmem [shape: bf16[16,32], index: 0, kind: input, shape index: {}]   ;;  %s241_s2 = inlined_call_operand.vmem [shape: f32[1,96], index: 2, kind: input, shape index: {}]   ;;  %s242_s3 = inlined_call_operand.vmem [shape: bf16[3,16,32], index: 3, kind: output, shape index: {}]  }
   0x1   :  { %160 = vmatprep.subr.bf16.mxu0 %v175_v0  ;;  %v172_v1 = vld [vmem:[%s239_s1] sm:$0xff]   ;;  %164 = vmatprep.mubr.msk.bf16.mxu0 %vm176_vm1, %v175_v0  ;;  %20 = vst.msk [vmem:[#allocation2] sm:$0xff] %vm19_vm0, %v175_v0  ;;  %21 = vst.msk [vmem:[#allocation2 + $0x8] sm:$0xff] %vm19_vm0, %v175_v0  ;;  %v173_v2 = vld [vmem:[%s239_s1 + $0x8] sm:$0xff]   ;;  %vm119_vm3 = vcmask 257024  }
   0x2   :  { %161 = vmatpush3.bf16.msra.mxu0 %v172_v1  ;;  %v174_v3 = vld [vmem:[%s240_s0] sm:$0xff]   ;;  %s177_s0 = smov 64  }
   0x3   :  { %162 = vmatprep.subr.bf16.mxu0 %v175_v0  ;;  %v148_v12 = vld [vmem:[%s241_s2] ss:$0 sm:$0xff] }
   0x6   :  { %163 = vmatpush3.bf16.msra.mxu0 %v173_v2 }
   0x8   :  { %v22_v4 = vld [vmem:[#allocation2] sm:$0xff]  ;;  %v23_v6 = vld [vmem:[#allocation2 + $0x8] sm:$0xff] }
   0x9   :  { %165 = vmatmul.mubr.msk.bf16.vlgmr.msra.gmra.mrb[0].mxu0 %vm47_vm2, %v174_v3 }
  0xdc   :  { %v85_v5 = vpop.f32.mrb[0].mxu0 }
  0xdd   :  { %v92_v7 = vadd.f32 %v85_v5, %v22_v4  ;;  %v166_v8 = vpop.f32.mrb[1].mxu0 }
  0xde   :  { %v88_v9 = vpop.f32.mrb[2].mxu0 }
  0xdf   :  { %95 = vst.msk [vmem:[#allocation2] sm:$0xff] %vm19_vm0, %v92_v7  ;;  %v93_v10 = vadd.f32 %v88_v9, %v23_v6  ;;  %v167_v11 = vpop.f32.mrb[3].mxu0 }
  0xe1   :  { %96 = vst.msk [vmem:[#allocation2 + $0x8] sm:$0xff] %vm19_vm0, %v93_v10 }
  0xe6   :  { %v100_v13 = vld [vmem:[#allocation2] sm:$0xff] }
  0xe7   :  { %v109_v14 = vadd.f32 %v148_v12, %v100_v13 }
  0xe8   :  { %v101_v15 = vld [vmem:[#allocation2 + $0x8] sm:$0xff] }
  0xe9   :  { %v155_v16 = vpack.c.bf16 %v109_v14, %v109_v14  ;;  %v110_v17 = vadd.f32 %v148_v12, %v101_v15 }
  0xeb   :  { %131 = vrot.lane.b32.xlu1 %v155_v16, %s177_s0  ;;  %120 = vst.msk [vmem:[%s242_s3] sm:$0xf] %vm119_vm3, %v155_v16  ;;  %122 = vrot.lane.b32.xlu0 %v155_v16, %s178_s21  ;;  %v156_v18 = vpack.c.bf16 %v110_v17, %v110_v17 }
  0xed   :  { %121 = vst.msk [vmem:[%s242_s3 + $0x4] sm:$0xf] %vm119_vm3, %v156_v18 }
  0xef   :  { %133 = vrot.lane.b32.xlu1 %v156_v18, %s177_s0  ;;  %124 = vrot.lane.b32.xlu0 %v156_v18, %s178_s21 }
 0x15d   :  { %v132_v19 = vpop.permute.xlu1 %131  ;;  %v123_v20 = vpop.permute.xlu0 %122 }
 0x15e   :  { %153 = vst.msk [vmem:[%s242_s3 + $0x10] sm:$0xf] %vm119_vm3, %v132_v19  ;;  %151 = vst.msk [vmem:[%s242_s3 + $0x8] sm:$0xf] %vm119_vm3, %v123_v20 }
 0x161   :  { %v134_v21 = vpop.permute.xlu1 %133  ;;  %v125_v22 = vpop.permute.xlu0 %124 }
 0x162   :  { %154 = vst.msk [vmem:[%s242_s3 + $0x14] sm:$0xf] %vm119_vm3, %v134_v21  ;;  %152 = vst.msk [vmem:[%s242_s3 + $0xc] sm:$0xf] %vm119_vm3, %v125_v22 }

// kernel: bert_token_classification_forward.16
= control target key start
LH: loop header
LB: loop body
LE: loop exit
PB: predicated region body
PF: predicated region fallthrough
CT: control target
= control target key end

     0   :  { %vm28_vm0 = vcmask 261120   ;;  %v220_v0 = vmov 0.0   ;;  %vm221_vm1 = vmmov 0   ;;  %vm178_vm2 = vcmask 257024   ;;  %s293_s1 = inlined_call_operand.vmem [shape: bf16[32,32], index: 1, kind: input, shape index: {}]   ;;  %s294_s0 = inlined_call_operand.vmem [shape: bf16[16,32], index: 0, kind: input, shape index: {}]   ;;  %s295_s3 = inlined_call_operand.vmem [shape: bf16[16,32], index: 3, kind: input, shape index: {}]   ;;  %s296_s2 = inlined_call_operand.vmem [shape: f32[1,32], index: 2, kind: input, shape index: {}]   ;;  %s297_s4 = inlined_call_operand.vmem [shape: f32[1,32], index: 4, kind: input, shape index: {}]   ;;  %s298_s5 = inlined_call_operand.vmem [shape: f32[1,32], index: 5, kind: input, shape index: {}]   ;;  %s299_s6 = inlined_call_operand.vmem [shape: bf16[16,32], index: 6, kind: output, shape index: {}]  }
   0x1   :  { %203 = vmatprep.subr.bf16.mxu0 %v220_v0  ;;  %v213_v1 = vld [vmem:[%s293_s1] sm:$0xff]   ;;  %207 = vmatprep.mubr.msk.bf16.mxu0 %vm221_vm1, %v220_v0  ;;  %29 = vst.msk [vmem:[#allocation2] sm:$0xff] %vm28_vm0, %v220_v0  ;;  %30 = vst.msk [vmem:[#allocation2 + $0x8] sm:$0xff] %vm28_vm0, %v220_v0  ;;  %v214_v2 = vld [vmem:[%s293_s1 + $0x8] sm:$0xff]  }
   0x2   :  { %204 = vmatpush3.bf16.msra.mxu0 %v213_v1  ;;  %v215_v3 = vld [vmem:[%s294_s0] sm:$0xff]  }
   0x3   :  { %205 = vmatprep.subr.bf16.mxu0 %v220_v0  ;;  %v197_v12 = vld [vmem:[%s295_s3] sm:$0xff]  }
   0x4   :  { %v189_v13 = vld [vmem:[%s296_s2] ss:$0 sm:$0xff]  ;;  %v198_v14 = vunpack.c.l.bf16 %v197_v12  ;;  %v199_v17 = vunpack.c.h.bf16 %v197_v12 }
   0x5   :  { %v190_v41 = vld [vmem:[%s297_s4] ss:$0 sm:$0xff] }
   0x6   :  { %206 = vmatpush3.bf16.msra.mxu0 %v214_v2  ;;  %v191_v43 = vld [vmem:[%s298_s5] ss:$0 sm:$0xff] }
   0x8   :  { %v31_v4 = vld [vmem:[#allocation2] sm:$0xff]  ;;  %v32_v6 = vld [vmem:[#allocation2 + $0x8] sm:$0xff] }
   0x9   :  { %208 = vmatmul.mubr.msk.bf16.vlgmr.msra.gmra.mrb[0].mxu0 %vm28_vm0, %v215_v3 }
  0xdc   :  { %v94_v5 = vpop.f32.mrb[0].mxu0 }
  0xdd   :  { %v101_v7 = vadd.f32 %v94_v5, %v31_v4  ;;  %v209_v8 = vpop.f32.mrb[1].mxu0 }
  0xde   :  { %v97_v9 = vpop.f32.mrb[2].mxu0 }
  0xdf   :  { %103 = vst.msk [vmem:[#allocation2] sm:$0xff] %vm28_vm0, %v101_v7  ;;  %v102_v10 = vadd.f32 %v97_v9, %v32_v6  ;;  %v210_v11 = vpop.f32.mrb[3].mxu0 }
  0xe1   :  { %104 = vst.msk [vmem:[#allocation2 + $0x8] sm:$0xff] %vm28_vm0, %v102_v10 }
  0xe6   :  { %v108_v15 = vld [vmem:[#allocation2] sm:$0xff] }
  0xe7   :  { %v117_v16 = vadd.f32 %v189_v13, %v108_v15 }
  0xe8   :  { %v109_v18 = vld [vmem:[#allocation2 + $0x8] sm:$0xff] }
  0xe9   :  { %v123_v19 = vadd.f32 %v198_v14, %v117_v16  ;;  %v118_v20 = vadd.f32 %v189_v13, %v109_v18 }
  0xeb   :  { %v125_v21 = vsel %vm28_vm0, %v123_v19, 0.0  ;;  %v124_v22 = vadd.f32 %v199_v17, %v118_v20 }
  0xec   :  { %126 = vadd.xlane.f32.xlu0 %v125_v21 }
  0xed   :  { %v128_v23 = vsel %vm28_vm0, %v124_v22, 0.0 }
  0xf0   :  { %129 = vadd.xlane.f32.xlu0 %v128_v23 }
 0x179   :  { %v127_v24 = vpop.xlane.xlu0 %126 }
 0x17a   :  { %v132_v25 = vmul.f32 0.03125, %v127_v24 }
 0x17c   :  { %v134_v26 = vsub.f32 %v123_v19, %v132_v25 }
 0x17d   :  { %v130_v27 = vpop.xlane.xlu0 %129 }
 0x17e   :  { %v133_v28 = vmul.f32 0.03125, %v130_v27  ;;  %v136_v29 = vmul.f32 %v134_v26, %v134_v26 }
 0x180   :  { %v135_v30 = vsub.f32 %v124_v22, %v133_v28  ;;  %v138_v31 = vsel %vm28_vm0, %v136_v29, 0.0 }
 0x181   :  { %139 = vadd.xlane.f32.xlu1 %v138_v31 }
 0x182   :  { %v137_v32 = vmul.f32 %v135_v30, %v135_v30 }
 0x184   :  { %v141_v33 = vsel %vm28_vm0, %v137_v32, 0.0 }
 0x185   :  { %142 = vadd.xlane.f32.xlu1 %v141_v33 }
 0x20e   :  { %v140_v34 = vpop.xlane.xlu1 %139 }
 0x20f   :  { %v144_v35 = vmul.f32 0.03125, %v140_v34 }
 0x211   :  { %v146_v36 = vadd.f32 1e-12, %v144_v35 }
 0x212   :  { %v143_v37 = vpop.xlane.xlu1 %142 }
 0x213   :  { %216 = vrsqrt.f32 %v146_v36  ;;  %v145_v38 = vmul.f32 0.03125, %v143_v37 }
 0x215   :  { %v147_v39 = vadd.f32 1e-12, %v145_v38 }
 0x217   :  { %218 = vrsqrt.f32 %v147_v39 }
 0x21d   :  { %v217_v40 = vpop.eup %216 }
 0x21e   :  { %v150_v42 = vmul.f32 %v217_v40, %v134_v26 }
 0x220   :  { %v159_v44 = vmul.f32 %v190_v41, %v150_v42 }
 0x221   :  { %v219_v45 = vpop.eup %218 }
 0x222   :  { %v168_v46 = vadd.f32 %v191_v43, %v159_v44  ;;  %v151_v47 = vmul.f32 %v219_v45, %v135_v30 }
 0x224   :  { %v194_v48 = vpack.c.bf16 %v168_v46, %v168_v46  ;;  %v160_v49 = vmul.f32 %v190_v41, %v151_v47 }
 0x226   :  { %179 = vst.msk [vmem:[%s299_s6] sm:$0xf] %vm178_vm2, %v194_v48  ;;  %v169_v50 = vadd.f32 %v191_v43, %v160_v49 }
 0x228   :  { %v195_v51 = vpack.c.bf16 %v169_v50, %v169_v50 }
 0x22a   :  { %180 = vst.msk [vmem:[%s299_s6 + $0x4] sm:$0xf] %vm178_vm2, %v195_v51 }

// kernel: bert_token_classification_forward.15
= control target key start
LH: loop header
LB: loop body
LE: loop exit
PB: predicated region body
PF: predicated region fallthrough
CT: control target
= control target key end

     0   :  { %s895_s15 = smov 0   ;;  %s897_s16 = smov 0   ;;  %s977_s0 = inlined_call_operand.vmem [shape: bf16[3,16,32], index: 0, kind: input, shape index: {}, may-alias: {0,1,2}]   ;;  %s978_s1 = inlined_call_operand.vmem [shape: bf16[3,16,32], index: 1, kind: input, shape index: {}, may-alias: {0,1,2}]   ;;  %s979_s2 = inlined_call_operand.vmem [shape: bf16[3,16,32], index: 2, kind: input, shape index: {}, may-alias: {0,1,2}]   ;;  %s980_s3 = inlined_call_operand.vmem [shape: f32[2,1,8], index: 3, kind: input, shape index: {}]   ;;  %s981_s4 = inlined_call_operand.vmem [shape: bf16[16,32], index: 4, kind: output, shape index: {}]  }
   0x1   :  { %s899_s17 = smov 0  }
   0x2 LB: > { %s33_s18 = sadd.s32 1, %s857_s16  ;;  %p741_p0 = scmp.ge.s32.totalorder %s861_s17, 1  ;;  %s861_s17 = sphi %s899_s17, %s14_s17   ;;  %s857_s16 = sphi %s897_s16, %s983_s16   ;;  %s853_s15 = sphi %s895_s15, %s982_s15  }
   0x3   : > { %p35_p1 = scmp.ge.s32.totalorder %s33_s18, 2  ;;  %p227_p2 = scmp.lt.s32.totalorder %s861_s17, 3 }
   0x5   : > { %s985_s18 = smov (%p35_p1, %s33_s18), 0  ;;  %p228_p3 = pnand %p741_p0, %p227_p2 }
   0x6   : > { %p272_p4 = scmp.lt.s32.totalorder (!%p228_p3), %s853_s15, 1  ;;  %v863_v0 = vmov (!%p228_p3), 0.0   ;;  %vm864_vm0 = vmmov (!%p228_p3), 0   ;;  %vm322_vm1 = vcmask (!%p228_p3), 130048   ;;  %vm308_vm2 = vcmask (!%p228_p3), 15360   ;;  %s867_s6 = smov (!%p228_p3), 112  }
   0x7   : > { %231 = sbr.rel (%p228_p3) target bundleno = 1409 (0x581), region = 36  ;;  %768 = vmatprep.subr.bf16.mxu0 (!%p228_p3), %v863_v0  ;;  %770 = vmatprep.mubr.msk.bf16.mxu0 (!%p228_p3), %vm864_vm0, %v863_v0  ;;  %v865_v4 = vmov (!%p228_p3), -1e+30   ;;  %310 = vst.msk [vmem:[#allocation3] sm:$0xff] (!%p228_p3), %vm308_vm2, %v863_v0  ;;  %vm371_vm3 = vcmask (!%p228_p3), 64512   ;;  %v866_v12 = vmov (!%p228_p3), 0  }
   0x8   : > { %774 = vmatprep.subr.bf16.mxu1 (!%p228_p3), %v863_v0  ;;  %776 = vmatprep.mubr.msk.bf16.mxu1 (!%p228_p3), %vm864_vm0, %v863_v0  ;;  %309 = vst.msk [vmem:[#allocation2] sm:$0xff] (!%p228_p3), %vm308_vm2, %v865_v4  ;;  %vm392_vm4 = vcmask (!%p228_p3), 7168   ;;  %vm406_vm5 = vcmask (!%p228_p3), 1043456   ;;  %vm311_vm6 = vcmask (!%p228_p3), 261120   ;;  %v868_v53 = vmov (!%p228_p3), 1   ;;  %s869_s7 = smov (!%p228_p3), 16  }
   0x9   : > { %823 = vset.pattern.permute.xlu0 (!%p228_p3), %v866_v12  ;;  %312 = vst.msk [vmem:[#allocation4] sm:$0xff] (!%p228_p3), %vm311_vm6, %v863_v0  ;;  %824 = vset.pattern.permute.xlu1 (!%p228_p3), %v868_v53  ;;  %vm533_vm7 = vcmask (!%p228_p3), 15368   ;;  %vm600_vm8 = vcmask (!%p228_p3), 261248   ;;  %vm625_vm9 = vcmask (!%p228_p3), 257024  }
   0xe   : > { %s987_s15 = smov (!%p272_p4, %s853_s15), 1  ;;  %v370_v35 = vld [vmem:[#allocation3] sm:$0xff] }
   0xf   : > { %s919_s19 = sshll.u32 %s987_s15, 2  ;;  %s296_s28 = scalar_lea.vmem %s980_s3, %s987_s15  ;;  %v369_v15 = vld [vmem:[#allocation2] sm:$0xff] }
  0x10   : > { %s674_s22 = scalar_lea.vmem %s978_s1, %s919_s19  ;;  %s275_s25 = scalar_lea.vmem %s977_s0, %s919_s19  ;;  %v938_v5 = vld [vmem:[%s296_s28] ss:$0 sm:$0xff]  ;;  %v394_v39 = vld [vmem:[#allocation4] sm:$0xff] }
  0x11   : > { %v746_v1 = vld [vmem:[%s674_s22 + $0x8] sm:$0xf]  ;;  %v314_v3 = vld [vmem:[%s275_s25] sm:$0xf]  ;;  %s677_s5 = scalar_lea.vmem %s979_s2, %s919_s19  ;;  %s301_s10 = scalar_lea.vmem %s981_s4, %s919_s19 }
  0x12   : > { %v327_v2 = vsel %vm322_vm1, %v746_v1, 0  ;;  %v826_v13 = vld [vmem:[%s674_s22 + $0x8] ss:$0 sps:$4 sm:$0xff]   ;;  %v827_v14 = vld [vmem:[%s275_s25] ss:$0 sps:$4 sm:$0xff]  }
  0x13   : > { %769 = vmatpush3.bf16.xpose.msra.mxu0 %v327_v2  ;;  %463 = vrot.lane.b32.xlu1 %v826_v13, %s867_s6  ;;  %v828_v19 = vld [vmem:[%s677_s5 + $0x10] ss:$0 sps:$4 sm:$0xff]  }
  0x14   : > { %786 = vmatprep.subr.bf16.mxu0 %v863_v0  ;;  %v749_v20 = vld [vmem:[%s677_s5 + $0x10] sm:$0xf] }
  0x15   : > { %v408_v21 = vsel %vm406_vm5, %v749_v20, 0 }
  0x16   : > { %775 = vmatpush3.bf16.msra.mxu1 %v408_v21 }
  0x17   : > { %458 = vrot.lane.b32.xlu1 %v827_v14, %s867_s6  ;;  %780 = vmatprep.subr.bf16.mxu1 %v863_v0 }
  0x1a   : > { %771 = vmatmul.mubr.msk.bf16.vlgmr.msra.gmra.mrb[0].mxu0 %vm322_vm1, %v314_v3 }
  0x1b   : > { %788 = vmatprep.mubr.msk.bf16.mxu0 %vm864_vm0, %v863_v0 }
  0x85   : > { %v464_v27 = vpop.permute.xlu1 %463 }
  0x86   : > { %v469_v29 = vsel %vm322_vm1, %v464_v27, 0 }
  0x89   : > { %v459_v32 = vpop.permute.xlu1 %458 }
  0xed   : > { %v363_v6 = vpop.f32.mrb[0].mxu0 }
  0xee   : > { %v364_v7 = vadd.f32 %v938_v5, %v363_v6  ;;  %v772_v8 = vpop.f32.mrb[1].mxu0 }
  0xef   : > { %v366_v9 = vpop.f32.mrb[2].mxu0 }
  0xf0   : > { %v773_v10 = vpop.f32.mrb[3].mxu0  ;;  %v372_v11 = vsel %vm371_vm3, %v364_v7, -inf }
  0xf1   : > { %373 = vmax.xlane.f32.xlu0 %v372_v11 }
 0x17e   : > { %v374_v16 = vpop.xlane.xlu0 %373 }
 0x17f   : > { %v375_v17 = vmax.f32 %v369_v15, %v374_v16 }
 0x181   : > { %v376_v18 = vsub.f32 %v369_v15, %v375_v17  ;;  %452 = vst.msk [vmem:[#allocation2] sm:$0xff] %vm392_vm4, %v375_v17  ;;  %381 = vperm.xlu0 %823, %v375_v17  }
 0x183   : > { %v377_v33 = vmul.f32 1.442695, %v376_v18 }
 0x185   : > { %547 = vrot.lane.b32.xlu0 %v828_v19, %s867_s6 }
 0x188   : > { %v511_v55 = vld [vmem:[#allocation2] sm:$0xff] }
 0x200   : > { %v382_v22 = vpop.permute.xlu0 %381 }
 0x201   : > { %v384_v23 = vsub.f32 %v364_v7, %v382_v22 }
 0x203   : > { %v385_v24 = vmul.f32 1.442695, %v384_v23 }
 0x204   : > { %v548_v25 = vpop.permute.xlu0 %547 }
 0x205   : > { %829 = vpow2.f32 %v385_v24  ;;  %v553_v26 = vsel %vm406_vm5, %v548_v25, 0 }
 0x206   : > { %787 = vmatpush3.bf16.msra.mxu0 %v553_v26  ;;  %831 = vpow2.f32 %v377_v33 }
 0x20f   : > { %v830_v28 = vpop.eup %829 }
 0x210   : > { %v388_v30 = vsel %vm371_vm3, %v830_v28, 0.0  ;;  %v401_v31 = vpack.c.bf16 %v830_v28, %v830_v28  ;;  %v832_v34 = vpop.eup %831 }
 0x211   : > { %389 = vadd.xlane.f32.xlu0 %v388_v30  ;;  %v387_v36 = vmul.f32 %v832_v34, %v370_v35 }
 0x212   : > { %777 = vmatmul.mubr.msk.bf16.vlgmr.msra.gmra.mrb[0].mxu1 %vm371_vm3, %v401_v31 }
 0x213   : > { %781 = vmatpush3.bf16.xpose.msra.mxu1 %v469_v29  ;;  %782 = vmatprep.mubr.msk.bf16.mxu1 %vm864_vm0, %v863_v0 }
 0x21a   : > { %783 = vmatmul.mubr.msk.bf16.vlgmr.msra.gmra.mrb[4].mxu1 %vm322_vm1, %v459_v32 }
 0x227   : > { %397 = vperm.xlu0 %823, %v832_v34  }
 0x29e   : > { %v390_v37 = vpop.xlane.xlu0 %389 }
 0x29f   : > { %v391_v38 = vadd.f32 %v390_v37, %v387_v36 }
 0x2a1   : > { %393 = vst.msk [vmem:[#allocation3] sm:$0xff] %vm392_vm4, %v391_v38 }
 0x2a6   : > { %v398_v40 = vpop.permute.xlu0 %397 }
 0x2a7   : > { %v400_v41 = vmul.f32 %v398_v40, %v394_v39 }
 0x2a8   : > { %v512_v2 = vld [vmem:[#allocation3] sm:$0xff] }
 0x2e5   : > { %v444_v42 = vpop.f32.mrb[0].mxu1 }
 0x2e6   : > { %v450_v43 = vadd.f32 %v444_v42, %v400_v41  ;;  %v778_v44 = vpop.f32.mrb[1].mxu1 }
 0x2e7   : > { %v447_v45 = vpop.f32.mrb[2].mxu1 }
 0x2e8   : > { %451 = vst.msk [vmem:[#allocation4] sm:$0xff] %vm322_vm1, %v450_v43  ;;  %v779_v46 = vpop.f32.mrb[3].mxu1 }
 0x2ed   : > { %v505_v47 = vpop.f32.mrb[4].mxu1 }
 0x2ee   : > { %v506_v48 = vadd.f32 %v938_v5, %v505_v47  ;;  %v784_v49 = vpop.f32.mrb[5].mxu1 }
 0x2ef   : > { %v508_v50 = vpop.f32.mrb[6].mxu1  ;;  %v535_v13 = vld [vmem:[#allocation4] sm:$0xff] }
 0x2f0   : > { %v785_v51 = vpop.f32.mrb[7].mxu1  ;;  %v513_v52 = vsel %vm371_vm3, %v506_v48, -inf }
 0x2f1   : > { %514 = vmax.xlane.f32.xlu1 %v513_v52 }
 0x37e   : > { %v515_v54 = vpop.xlane.xlu1 %514 }
 0x37f   : > { %v516_v56 = vmax.f32 %v511_v55, %v515_v54 }
 0x381   : > { %v517_v57 = vsub.f32 %v511_v55, %v516_v56  ;;  %602 = vst.msk [vmem:[#allocation2] sm:$0xff] %vm533_vm7, %v516_v56  ;;  %522 = vperm.xlu1 %824, %v516_v56  }
 0x383   : > { %v518_v0 = vmul.f32 1.442695, %v517_v57 }
 0x400   : > { %v523_v58 = vpop.permute.xlu1 %522 }
 0x401   : > { %v525_v59 = vsub.f32 %v506_v48, %v523_v58 }
 0x403   : > { %v526_v60 = vmul.f32 1.442695, %v525_v59 }
 0x405   : > { %833 = vpow2.f32 %v526_v60 }
 0x406   : > { %835 = vpow2.f32 %v518_v0 }
 0x40f   : > { %v834_v61 = vpop.eup %833 }
 0x410   : > { %v529_v62 = vsel %vm371_vm3, %v834_v61, 0.0  ;;  %v542_v63 = vpack.c.bf16 %v834_v61, %v834_v61  ;;  %v836_v1 = vpop.eup %835 }
 0x411   : > { %530 = vadd.xlane.f32.xlu1 %v529_v62  ;;  %v528_v3 = vmul.f32 %v836_v1, %v512_v2 }
 0x412   : > { %789 = vmatmul.mubr.msk.bf16.vlgmr.msra.gmra.mrb[4].mxu0 %vm371_vm3, %v542_v63 }
 0x422   : > { %538 = vperm.xlu1 %824, %v836_v1  }
 0x49e   : > { %v531_v4 = vpop.xlane.xlu1 %530 }
 0x49f   : > { %v532_v5 = vadd.f32 %v531_v4, %v528_v3 }
 0x4a1   : > { %534 = vst.msk [vmem:[#allocation3] sm:$0xff] %vm533_vm7, %v532_v5 }
 0x4a2   : > { %v539_v12 = vpop.permute.xlu1 %538 }
 0x4a3   : > { %v541_v14 = vmul.f32 %v539_v12, %v535_v13 }
 0x4a8   : > { %v606_v6 = vld [vmem:[#allocation3] sm:$0xff] }
 0x4a9   : > { %837 = vrcp.f32 %v606_v6 }
 0x4b3   : > { %v838_v11 = vpop.eup %837 }
 0x4e5   : > { %v589_v7 = vpop.f32.mrb[4].mxu0 }
 0x4e6   : > { %596 = vrot.lane.b32.xlu0 %v589_v7, %s869_s7  ;;  %v790_v8 = vpop.f32.mrb[5].mxu0 }
 0x4e7   : > { %v592_v9 = vpop.f32.mrb[6].mxu0 }
 0x4e8   : > { %v791_v10 = vpop.f32.mrb[7].mxu0 }
 0x4ea   : > { %611 = vperm.xlu0 %823, %v838_v11  }
 0x4ee   : > { %825 = vset.pattern.permute.xlu0 %v868_v53 }
 0x4ef   : > { %618 = vperm.xlu0 %825, %v838_v11  }
 0x558   : > { %v597_v15 = vpop.permute.xlu0 %596 }
 0x559   : > { %v599_v16 = vadd.f32 %v597_v15, %v541_v14 }
 0x55b   : > { %601 = vst.msk [vmem:[#allocation4] sm:$0xff] %vm600_vm8, %v599_v16 }
 0x562   : > { %v608_v17 = vld [vmem:[#allocation4] sm:$0xff] }
 0x569   : > { %v612_v18 = vpop.permute.xlu0 %611 }
 0x56a   : > { %v614_v19 = vmul.f32 %v612_v18, %v608_v17 }
 0x56c   : > { %615 = vst.msk [vmem:[#allocation4] sm:$0xff] %vm322_vm1, %v614_v19 }
 0x56e   : > { %v619_v21 = vpop.permute.xlu0 %618 }
 0x573   : > { %v616_v20 = vld [vmem:[#allocation4] sm:$0xff] }
 0x574   : > { %v621_v22 = vmul.f32 %v619_v21, %v616_v20 }
 0x576   : > { %622 = vst.msk [vmem:[#allocation4] sm:$0xff] %vm600_vm8, %v621_v22 }
 0x57d   : > { %v623_v23 = vld [vmem:[#allocation4] sm:$0xff] }
 0x57e   : > { %v624_v24 = vpack.c.bf16 %v623_v23, %v623_v23 }
 0x580   : > { %626 = vst.msk [vmem:[%s301_s10] sm:$0xf] %vm625_vm9, %v624_v24 }
 0x581 PF: > { %s14_s17 = sadd.s32 1, %s861_s17   ;;  %s982_s15 = smov %s857_s16 }
 0x582   : > { %p11_p5 = scmp.ge.s32.totalorder %s14_s17, 4   ;;  %s983_s16 = smov %s985_s18 }
 0x584   :  { %13 = sbr.rel (!%p11_p5) target bundleno = 2 (0x2), region = 83 }

// kernel: bert_token_classification_forward.17
= control target key start
LH: loop header
LB: loop body
LE: loop exit
PB: predicated region body
PF: predicated region fallthrough
CT: control target
= control target key end

     0   :  { %vm19_vm0 = vcmask 523264   ;;  %v173_v0 = vmov 0.0   ;;  %vm174_vm1 = vmmov 0   ;;  %vm47_vm2 = vcmask 261120   ;;  %s217_s1 = inlined_call_operand.vmem [shape: bf16[32,64], index: 1, kind: input, shape index: {}]   ;;  %s218_s0 = inlined_call_operand.vmem [shape: bf16[16,32], index: 0, kind: input, shape index: {}]   ;;  %s219_s2 = inlined_call_operand.vmem [shape: f32[1,64], index: 2, kind: input, shape index: {}]   ;;  %s220_s3 = inlined_call_operand.vmem [shape: bf16[16,64], index: 3, kind: output, shape index: {}]  }
   0x1   :  { %156 = vmatprep.subr.bf16.mxu0 %v173_v0  ;;  %v166_v1 = vld [vmem:[%s217_s1] sm:$0xff]   ;;  %160 = vmatprep.mubr.msk.bf16.mxu0 %vm174_vm1, %v173_v0  ;;  %20 = vst.msk [vmem:[#allocation2] sm:$0xff] %vm19_vm0, %v173_v0  ;;  %21 = vst.msk [vmem:[#allocation2 + $0x8] sm:$0xff] %vm19_vm0, %v173_v0  ;;  %v167_v2 = vld [vmem:[%s217_s1 + $0x8] sm:$0xff]   ;;  %vm137_vm3 = vcmask 519168  }
   0x2   :  { %157 = vmatpush3.bf16.msra.mxu0 %v166_v1  ;;  %v168_v3 = vld [vmem:[%s218_s0] sm:$0xff]  }
   0x3   :  { %158 = vmatprep.subr.bf16.mxu0 %v173_v0  ;;  %v148_v12 = vld [vmem:[%s219_s2] ss:$0 sm:$0xff] }
   0x6   :  { %159 = vmatpush3.bf16.msra.mxu0 %v167_v2 }
   0x8   :  { %v22_v4 = vld [vmem:[#allocation2] sm:$0xff]  ;;  %v23_v6 = vld [vmem:[#allocation2 + $0x8] sm:$0xff] }
   0x9   :  { %161 = vmatmul.mubr.msk.bf16.vlgmr.msra.gmra.mrb[0].mxu0 %vm47_vm2, %v168_v3 }
  0xdc   :  { %v85_v5 = vpop.f32.mrb[0].mxu0 }
  0xdd   :  { %v92_v7 = vadd.f32 %v85_v5, %v22_v4  ;;  %v162_v8 = vpop.f32.mrb[1].mxu0 }
  0xde   :  { %v88_v9 = vpop.f32.mrb[2].mxu0 }
  0xdf   :  { %95 = vst.msk [vmem:[#allocation2] sm:$0xff] %vm19_vm0, %v92_v7  ;;  %v93_v10 = vadd.f32 %v88_v9, %v23_v6  ;;  %v163_v11 = vpop.f32.mrb[3].mxu0 }
  0xe1   :  { %96 = vst.msk [vmem:[#allocation2 + $0x8] sm:$0xff] %vm19_vm0, %v93_v10 }
  0xe6   :  { %v100_v13 = vld [vmem:[#allocation2] sm:$0xff] }
  0xe7   :  { %v109_v14 = vadd.f32 %v148_v12, %v100_v13 }
  0xe8   :  { %v101_v15 = vld [vmem:[#allocation2 + $0x8] sm:$0xff] }
  0xe9   :  { %v113_v16 = vmul.f32 0.044715, %v109_v14  ;;  %v110_v17 = vadd.f32 %v148_v12, %v101_v15  ;;  %v111_v28 = vmul.f32 0.5, %v109_v14 }
  0xeb   :  { %v115_v18 = vmul.f32 %v113_v16, %v109_v14  ;;  %v114_v19 = vmul.f32 0.044715, %v110_v17  ;;  %v112_v32 = vmul.f32 0.5, %v110_v17 }
  0xed   :  { %v117_v20 = vmul.f32 %v115_v18, %v109_v14  ;;  %v116_v21 = vmul.f32 %v114_v19, %v110_v17 }
  0xef   :  { %v119_v22 = vadd.f32 %v117_v20, %v109_v14  ;;  %v118_v23 = vmul.f32 %v116_v21, %v110_v17 }
  0xf1   :  { %v121_v24 = vmul.f32 0.7978846, %v119_v22  ;;  %v120_v25 = vadd.f32 %v118_v23, %v110_v17 }
  0xf3   :  { %169 = vtanh.f32 %v121_v24  ;;  %v122_v26 = vmul.f32 0.7978846, %v120_v25 }
  0xf5   :  { %171 = vtanh.f32 %v122_v26 }
  0xfd   :  { %v170_v27 = vpop.eup %169 }
  0xfe   :  { %v125_v29 = vadd.f32 1.0, %v170_v27 }
  0xff   :  { %v172_v30 = vpop.eup %171 }
 0x100   :  { %v127_v31 = vmul.f32 %v125_v29, %v111_v28  ;;  %v126_v33 = vadd.f32 1.0, %v172_v30 }
 0x102   :  { %v151_v34 = vpack.c.bf16 %v127_v31, %v127_v31  ;;  %v128_v35 = vmul.f32 %v126_v33, %v112_v32 }
 0x104   :  { %138 = vst.msk [vmem:[%s220_s3] sm:$0xf] %vm137_vm3, %v151_v34  ;;  %v152_v36 = vpack.c.bf16 %v128_v35, %v128_v35 }
 0x106   :  { %139 = vst.msk [vmem:[%s220_s3 + $0x4] sm:$0xf] %vm137_vm3, %v152_v36 }

// kernel: bert_token_classification_forward.18
= control target key start
LH: loop header
LB: loop body
LE: loop exit
PB: predicated region body
PF: predicated region fallthrough
CT: control target
= control target key end

     0   :  { %vm28_vm0 = vcmask 261120   ;;  %v247_v0 = vmov 0.0   ;;  %vm248_vm1 = vmmov 0   ;;  %vm72_vm2 = vcmask 523264   ;;  %s325_s1 = inlined_call_operand.vmem [shape: bf16[64,32], index: 1, kind: input, shape index: {}]   ;;  %s326_s0 = inlined_call_operand.vmem [shape: bf16[16,64], index: 0, kind: input, shape index: {}]   ;;  %s327_s3 = inlined_call_operand.vmem [shape: bf16[16,32], index: 3, kind: input, shape index: {}]   ;;  %s328_s2 = inlined_call_operand.vmem [shape: f32[1,32], index: 2, kind: input, shape index: {}]   ;;  %s329_s4 = inlined_call_operand.vmem [shape: f32[1,32], index: 4, kind: input, shape index: {}]   ;;  %s330_s5 = inlined_call_operand.vmem [shape: f32[1,32], index: 5, kind: input, shape index: {}]   ;;  %s331_s6 = inlined_call_operand.vmem [shape: bf16[16,32], index: 6, kind: output, shape index: {}]  }
   0x1   :  { %224 = vmatprep.subr.bf16.mxu0 %v247_v0  ;;  %v238_v1 = vld [vmem:[%s325_s1] sm:$0xff]   ;;  %232 = vmatprep.mubr.msk.bf16.mxu0 %vm248_vm1, %v247_v0  ;;  %29 = vst.msk [vmem:[#allocation2] sm:$0xff] %vm28_vm0, %v247_v0  ;;  %30 = vst.msk [vmem:[#allocation2 + $0x8] sm:$0xff] %vm28_vm0, %v247_v0  ;;  %v239_v2 = vld [vmem:[%s325_s1 + $0x8] sm:$0xff]   ;;  %vm195_vm3 = vcmask 257024  }
   0x2   :  { %225 = vmatpush3.bf16.msra.mxu0 %v238_v1  ;;  %v240_v3 = vld [vmem:[%s325_s1 + $0x10] sm:$0xff]   ;;  %v241_v4 = vld [vmem:[%s325_s1 + $0x18] sm:$0xff]   ;;  %v242_v5 = vld [vmem:[%s326_s0] sm:$0xff]  }
   0x3   :  { %226 = vmatprep.subr.bf16.mxu0 %v247_v0  ;;  %v216_v14 = vld [vmem:[%s327_s3] sm:$0xff]  }
   0x4   :  { %v208_v15 = vld [vmem:[%s328_s2] ss:$0 sm:$0xff]  ;;  %v217_v16 = vunpack.c.l.bf16 %v216_v14  ;;  %v218_v19 = vunpack.c.h.bf16 %v216_v14 }
   0x5   :  { %v209_v43 = vld [vmem:[%s329_s4] ss:$0 sm:$0xff] }
   0x6   :  { %227 = vmatpush3.bf16.msra.mxu0 %v239_v2  ;;  %v210_v45 = vld [vmem:[%s330_s5] ss:$0 sm:$0xff] }
   0x7   :  { %228 = vmatprep.subr.bf16.mxu0 %v247_v0 }
   0x8   :  { %v31_v6 = vld [vmem:[#allocation2] sm:$0xff]  ;;  %v32_v8 = vld [vmem:[#allocation2 + $0x8] sm:$0xff] }
   0xa   :  { %229 = vmatpush3.bf16.msra.mxu0 %v240_v3 }
   0xb   :  { %230 = vmatprep.subr.bf16.mxu0 %v247_v0 }
   0xe   :  { %231 = vmatpush3.bf16.msra.mxu0 %v241_v4 }
  0x11   :  { %233 = vmatmul.mubr.msk.bf16.vlgmr.msra.gmra.mrb[0].mxu0 %vm72_vm2, %v242_v5 }
  0xe4   :  { %v110_v7 = vpop.f32.mrb[0].mxu0 }
  0xe5   :  { %v117_v9 = vadd.f32 %v110_v7, %v31_v6  ;;  %v234_v10 = vpop.f32.mrb[1].mxu0 }
  0xe6   :  { %v113_v11 = vpop.f32.mrb[2].mxu0 }
  0xe7   :  { %120 = vst.msk [vmem:[#allocation2] sm:$0xff] %vm28_vm0, %v117_v9  ;;  %v118_v12 = vadd.f32 %v113_v11, %v32_v8  ;;  %v235_v13 = vpop.f32.mrb[3].mxu0 }
  0xe9   :  { %121 = vst.msk [vmem:[#allocation2 + $0x8] sm:$0xff] %vm28_vm0, %v118_v12 }
  0xee   :  { %v125_v17 = vld [vmem:[#allocation2] sm:$0xff] }
  0xef   :  { %v134_v18 = vadd.f32 %v208_v15, %v125_v17 }
  0xf0   :  { %v126_v20 = vld [vmem:[#allocation2 + $0x8] sm:$0xff] }
  0xf1   :  { %v140_v21 = vadd.f32 %v217_v16, %v134_v18  ;;  %v135_v22 = vadd.f32 %v208_v15, %v126_v20 }
  0xf3   :  { %v142_v23 = vsel %vm28_vm0, %v140_v21, 0.0  ;;  %v141_v24 = vadd.f32 %v218_v19, %v135_v22 }
  0xf4   :  { %143 = vadd.xlane.f32.xlu0 %v142_v23 }
  0xf5   :  { %v145_v25 = vsel %vm28_vm0, %v141_v24, 0.0 }
  0xf8   :  { %146 = vadd.xlane.f32.xlu0 %v145_v25 }
 0x181   :  { %v144_v26 = vpop.xlane.xlu0 %143 }
 0x182   :  { %v149_v27 = vmul.f32 0.03125, %v144_v26 }
 0x184   :  { %v151_v28 = vsub.f32 %v140_v21, %v149_v27 }
 0x185   :  { %v147_v29 = vpop.xlane.xlu0 %146 }
 0x186   :  { %v150_v30 = vmul.f32 0.03125, %v147_v29  ;;  %v153_v31 = vmul.f32 %v151_v28, %v151_v28 }
 0x188   :  { %v152_v32 = vsub.f32 %v141_v24, %v150_v30  ;;  %v155_v33 = vsel %vm28_vm0, %v153_v31, 0.0 }
 0x189   :  { %156 = vadd.xlane.f32.xlu1 %v155_v33 }
 0x18a   :  { %v154_v34 = vmul.f32 %v152_v32, %v152_v32 }
 0x18c   :  { %v158_v35 = vsel %vm28_vm0, %v154_v34, 0.0 }
 0x18d   :  { %159 = vadd.xlane.f32.xlu1 %v158_v35 }
 0x216   :  { %v157_v36 = vpop.xlane.xlu1 %156 }
 0x217   :  { %v161_v37 = vmul.f32 0.03125, %v157_v36 }
 0x219   :  { %v163_v38 = vadd.f32 1e-12, %v161_v37 }
 0x21a   :  { %v160_v39 = vpop.xlane.xlu1 %159 }
 0x21b   :  { %243 = vrsqrt.f32 %v163_v38  ;;  %v162_v40 = vmul.f32 0.03125, %v160_v39 }
 0x21d   :  { %v164_v41 = vadd.f32 1e-12, %v162_v40 }
 0x21f   :  { %245 = vrsqrt.f32 %v164_v41 }
 0x225   :  { %v244_v42 = vpop.eup %243 }
 0x226   :  { %v167_v44 = vmul.f32 %v244_v42, %v151_v28 }
 0x228   :  { %v176_v46 = vmul.f32 %v209_v43, %v167_v44 }
 0x229   :  { %v246_v47 = vpop.eup %245 }
 0x22a   :  { %v185_v48 = vadd.f32 %v210_v45, %v176_v46  ;;  %v168_v49 = vmul.f32 %v246_v47, %v152_v32 }
 0x22c   :  { %v213_v50 = vpack.c.bf16 %v185_v48, %v185_v48  ;;  %v177_v51 = vmul.f32 %v209_v43, %v168_v49 }
 0x22e   :  { %196 = vst.msk [vmem:[%s331_s6] sm:$0xf] %vm195_vm3, %v213_v50  ;;  %v186_v52 = vadd.f32 %v210_v45, %v177_v51 }
 0x230   :  { %v214_v53 = vpack.c.bf16 %v186_v52, %v186_v52 }
 0x232   :  { %197 = vst.msk [vmem:[%s331_s6 + $0x4] sm:$0xf] %vm195_vm3, %v214_v53 }

// kernel: bert_token_classification_forward.24
= control target key start
LH: loop header
LB: loop body
LE: loop exit
PB: predicated region body
PF: predicated region fallthrough
CT: control target
= control target key end

     0   :  { %v136_v0 = vmov 0.0   ;;  %vm137_vm0 = vmmov 0   ;;  %vm46_vm1 = vcmask 261120   ;;  %s176_s1 = inlined_call_operand.vmem [shape: bf16[32,128], index: 1, kind: input, shape index: {}]   ;;  %s177_s0 = inlined_call_operand.vmem [shape: bf16[16,32], index: 0, kind: input, shape index: {}]   ;;  %s178_s2 = inlined_call_operand.vmem [shape: f32[1,128], index: 2, kind: input, shape index: {}]   ;;  %s179_s3 = inlined_call_operand.vmem [shape: f32[16,128], index: 3, kind: output, shape index: {}]  }
   0x1   :  { %123 = vmatprep.subr.bf16.mxu0 %v136_v0  ;;  %v133_v1 = vld [vmem:[%s176_s1] sm:$0xff]   ;;  %127 = vmatprep.mubr.msk.bf16.mxu0 %vm137_vm0, %v136_v0  ;;  %v134_v2 = vld [vmem:[%s176_s1 + $0x8] sm:$0xff]  }
   0x2   :  { %124 = vmatpush3.bf16.msra.mxu0 %v133_v1  ;;  %v135_v3 = vld [vmem:[%s177_s0] sm:$0xff]  }
   0x3   :  { %125 = vmatprep.subr.bf16.mxu0 %v136_v0  ;;  %v119_v4 = vld [vmem:[%s178_s2] ss:$0 sm:$0xff] }
   0x6   :  { %126 = vmatpush3.bf16.msra.mxu0 %v134_v2 }
   0x9   :  { %128 = vmatmul.mubr.msk.bf16.vlgmr.msra.gmra.mrb[0].mxu0 %vm46_vm1, %v135_v3 }
  0xdc   :  { %v84_v5 = vpop.f32.mrb[0].mxu0 }
  0xdd   :  { %v107_v6 = vadd.f32 %v119_v4, %v84_v5  ;;  %v129_v7 = vpop.f32.mrb[1].mxu0 }
  0xde   :  { %v87_v8 = vpop.f32.mrb[2].mxu0 }
  0xdf   :  { %109 = vst [vmem:[%s179_s3] sm:$0xff] %v107_v6  ;;  %v108_v9 = vadd.f32 %v119_v4, %v87_v8  ;;  %v130_v10 = vpop.f32.mrb[3].mxu0 }
  0xe1   :  { %110 = vst [vmem:[%s179_s3 + $0x8] sm:$0xff] %v108_v9 }

// kernel: bert_token_classification_forward.25
= control target key start
LH: loop header
LB: loop body
LE: loop exit
PB: predicated region body
PF: predicated region fallthrough
CT: control target
= control target key end

     0   :  { %v170_v2 = vmov 0   ;;  %s221_s0 = inlined_call_operand.vmem [shape: f32[16,128], index: 0, kind: input, shape index: {}]   ;;  %s222_s1 = inlined_call_operand.vmem [shape: s32[16,1], index: 1, kind: input, shape index: {}]   ;;  %s223_s2 = inlined_call_operand.hbm [shape: f32[1,1], index: 2, kind: output, shape index: {}]  }
   0x1   :  { %v19_v0 = vld [vmem:[%s221_s0] sm:$0xff]  ;;  %134 = vset.pattern.permute.xlu1 %v170_v2 }
   0x2   :  { %v21_v1 = vld [vmem:[%s222_s1] sm:$0xff]  ;;  %23 = vmax.xlane.f32.xlu0 %v19_v0 }
   0x3   :  { %7 = vsyncpa [#allocation5], 0  ;;  %v20_v3 = vld [vmem:[%s221_s0 + $0x8] sm:$0xff]  ;;  %46 = vperm.xlu1 %134, %v21_v1   ;;  %135 = vset.pattern.permute.xlu0 %v170_v2  ;;  %v43_v10 = vlaneseq  ;;  %vm59_vm2 = vcmp.ne.s32.totalorder %v21_v1, 4294967196  ;;  %v171_v19 = vmov 0.0   ;;  %vm70_vm4 = vcmask 7168  }
   0x4   :  { %v22_v4 = vld [vmem:[%s222_s1 + $0x8] sm:$0xff]  ;;  %v125_v20 = vsel %vm59_vm2, 1.0, %v171_v19  ;;  %vm16_vm5 = vcmask 0   ;;  %s172_s17 = smov [#allocation4]  }
   0x5   :  { %v44_v13 = vand.u32 127, %v43_v10  ;;  %vm60_vm3 = vcmp.ne.s32.totalorder %v22_v4, 4294967196  ;;  %v88_v22 = vsel %vm70_vm4, %v125_v20, 0.0  ;;  %17 = vst.msk [vmem:[#allocation2] sm:$0x1] %vm16_vm5, %v171_v19  ;;  %s117_s18 = sshll.u32 %s172_s17, 4  ;;  %s118_s18 = int_to_ptr.vmem [resolvable:$true] %s117_s18 }
   0x6   :  { %25 = vmax.xlane.f32.xlu0 %v20_v3  ;;  %v126_v21 = vsel %vm60_vm3, 1.0, %v171_v19  ;;  %18 = vst.msk [vmem:[#allocation3] sm:$0x1] %vm16_vm5, %v171_v19  ;;  %s146_s19 = scalar_lea.vmem %s118_s18, 16  ;;  %s150_s20 = scalar_lea.vmem %s118_s18, 32 }
   0x7   :  { %49 = vperm.xlu1 %134, %v22_v4   ;;  %v89_v23 = vsel %vm70_vm4, %v126_v21, 0.0  ;;  %p147_p0 = scmp.ne.s32.totalorder %s118_s18, %s146_s19  ;;  %p151_p1 = scmp.lt.s32.totalorder %s118_s18, %s118_s18 }
   0x8   :  { %v90_v24 = vadd.f32 %v89_v23, %v88_v22  ;;  %p152_p2 = scmp.lt.s32.totalorder %s150_s20, %s146_s19 }
   0xa   :  { %p153_p3 = por %p152_p2, %p151_p1 }
   0xc   :  { %v65_v56 = vld [vmem:[#allocation2] sm:$0x1]  ;;  %p154_p4 = pnand %p153_p3, %p147_p0 }
   0xd   :  { %v87_v59 = vld [vmem:[#allocation3] sm:$0x1] }
  0x82   :  { %v47_v12 = vpop.permute.xlu1 %46 }
  0x83   :  { %vm51_vm0 = vcmp.eq.s32.totalorder %v44_v13, %v47_v12 }
  0x84   :  { %v53_v16 = vsel %vm51_vm0, %v19_v0, 0.0 }
  0x86   :  { %v50_v15 = vpop.permute.xlu1 %49 }
  0x87   :  { %vm52_vm1 = vcmp.eq.s32.totalorder %v44_v13, %v50_v15 }
  0x88   :  { %v54_v18 = vsel %vm52_vm1, %v20_v3, 0.0 }
  0x8f   :  { %v24_v5 = vpop.xlane.xlu0 %23 }
  0x90   :  { %v27_v6 = vsub.f32 %v19_v0, %v24_v5 }
  0x92   :  { %v29_v7 = vmul.f32 1.442695, %v27_v6 }
  0x93   :  { %v26_v8 = vpop.xlane.xlu0 %25 }
  0x94   :  { %136 = vpow2.f32 %v29_v7  ;;  %v28_v9 = vsub.f32 %v20_v3, %v26_v8 }
  0x96   :  { %v31_v11 = vmul.f32 1.442695, %v28_v9 }
  0x98   :  { %138 = vpow2.f32 %v31_v11 }
  0x9e   :  { %v137_v14 = vpop.eup %136 }
  0x9f   :  { %33 = vadd.xlane.f32.xlu0 %v137_v14 }
  0xa2   :  { %v139_v17 = vpop.eup %138 }
  0xa3   :  { %35 = vadd.xlane.f32.xlu1 %v139_v17  ;;  %55 = vadd.xlane.f32.xlu0 %v53_v16 }
  0xa7   :  { %57 = vadd.xlane.f32.xlu0 %v54_v18 }
 0x12c   :  { %v34_v25 = vpop.xlane.xlu0 %33 }
 0x12d   :  { %140 = vlog2.f32 %v34_v25 }
 0x130   :  { %v36_v26 = vpop.xlane.xlu1 %35  ;;  %v56_v29 = vpop.xlane.xlu0 %55 }
 0x131   :  { %142 = vlog2.f32 %v36_v26 }
 0x134   :  { %v58_v35 = vpop.xlane.xlu0 %57 }
 0x137   :  { %v141_v27 = vpop.eup %140 }
 0x138   :  { %v38_v28 = vmul.f32 0.6931472, %v141_v27 }
 0x13a   :  { %v41_v30 = vadd.f32 %v38_v28, %v24_v5 }
 0x13b   :  { %v143_v31 = vpop.eup %142 }
 0x13c   :  { %v40_v32 = vmul.f32 0.6931472, %v143_v31  ;;  %v66_v33 = vsub.f32 %v41_v30, %v56_v29 }
 0x13e   :  { %v42_v34 = vadd.f32 %v40_v32, %v26_v8  ;;  %v68_v36 = vmul.f32 %v125_v20, %v66_v33 }
 0x140   :  { %v67_v37 = vsub.f32 %v42_v34, %v58_v35  ;;  %v71_v39 = vsel %vm70_vm4, %v68_v36, 0.0 }
 0x142   :  { %v69_v38 = vmul.f32 %v126_v21, %v67_v37 }
 0x144   :  { %v72_v40 = vsel %vm70_vm4, %v69_v38, 0.0 }
 0x145   :  { %v73_v41 = vadd.f32 %v72_v40, %v71_v39 }
 0x147   :  { %74 = vadd.xlane.f32.xlu0 %v73_v41 }
 0x14b   :  { %91 = vadd.xlane.f32.xlu0 %v90_v24 }
 0x1d4   :  { %v75_v42 = vpop.xlane.xlu0 %74 }
 0x1d5   :  { %v76_v43 = vrot.slane %v75_v42, 4 }
 0x1d7   :  { %v77_v44 = vadd.f32 %v76_v43, %v75_v42 }
 0x1d8   :  { %v92_v45 = vpop.xlane.xlu0 %91 }
 0x1d9   :  { %v78_v46 = vrot.slane %v77_v44, 2  ;;  %v93_v47 = vrot.slane %v92_v45, 4 }
 0x1db   :  { %v94_v48 = vadd.f32 %v93_v47, %v92_v45  ;;  %v79_v49 = vadd.f32 %v78_v46, %v77_v44 }
 0x1dd   :  { %v95_v50 = vrot.slane %v94_v48, 2  ;;  %v80_v51 = vrot.slane %v79_v49, 1 }
 0x1df   :  { %v96_v52 = vadd.f32 %v95_v50, %v94_v48  ;;  %v81_v53 = vadd.f32 %v80_v51, %v79_v49 }
 0x1e1   :  { %127 = vpush %v81_v53  ;;  %v97_v54 = vrot.slane %v96_v52, 1 }
 0x1e3   :  { %v98_v55 = vadd.f32 %v97_v54, %v96_v52 }
 0x1e5   :  { %129 = vpush %v98_v55 }
 0x212   :  { %s128_s0 = spop %127 }
 0x213   :  { %v83_v57 = vstv %s128_s0 }
 0x214   :  { %v84_v58 = vadd.f32 %v83_v57, %v65_v56 }
 0x216   :  { %86 = vst.msk [vmem:[#allocation2] sm:$0x1] %vm16_vm5, %v84_v58  ;;  %s130_s1 = spop %129 }
 0x217   :  { %v100_v60 = vstv %s130_s1 }
 0x218   :  { %v101_v61 = vadd.f32 %v100_v60, %v87_v59 }
 0x21a   :  { %102 = vst.msk [vmem:[#allocation3] sm:$0x1] %vm16_vm5, %v101_v61 }
 0x21d   :  { %v106_v0 = vld [vmem:[#allocation2] sm:$0x1] }
 0x221   :  { %v107_v62 = vld [vmem:[#allocation3] sm:$0x1] }
 0x222   :  { %144 = vrcp.f32 %v107_v62 }
 0x22c   :  { %v145_v63 = vpop.eup %144 }
 0x22d   :  { %v109_v1 = vmul.f32 %v145_v63, %v106_v0 }
 0x22f   :  { %110 = vst.msk [vmem:[#allocation4] sm:$0x1] %vm16_vm5, %v109_v1 }
 0x230   :  { %157 = shalt.err (!%p154_p4)
}
 0x231   :  { %s158_s23 = scalar_lea.hbm %s223_s2, 16 }
 0x232   :  { %p159_p5 = scmp.ne.s32.totalorder %s223_s2, %s158_s23  ;;  %p162_p6 = scmp.lt.u32.totalorder %s158_s23, %s223_s2 }
 0x234   :  { %p164_p7 = pnand %p162_p6, %p159_p5 }
 0x236   :  { %167 = shalt.err (!%p164_p7)
}
 0x237   :  { %120 = dma.vmem_to_hbm [thread:$0]  %s118_s18, 16, %s223_s2, [#allocation5]  }
 0x238   :  { %168 = dma.done.wait [#allocation5], 16  }
 0x239   :  { %169 = vsyncadd [#allocation5], 4294967280 }
 0x23a   :  { %124 = vsyncpa [#allocation5], 1 }

</bundles_post_ra>
